<compile_context>
chip_gen: v7x
topology: tpu7x:2x2x1
jax: 0.10.0
libtpu: 0.0.40
codegen_flags: <defaults>
</compile_context>

<pallas_src>
import functools
import math

import numpy as np

import jax
import jax.numpy as jnp
from jax.experimental import pallas as pl
from jax.experimental.pallas import tpu as pltpu


def sagenet_kernel(h_ref, adj_ref, invdeg_ref, wcat_ref, bself_ref, out_ref, *,
                   num_layers, compute_dtype):
    """Per-step kernel: one grid step == Bt graphs.

    h_ref      : (Bt, N, D)   node features (float32)
    adj_ref    : (Bt, N, N)   binary adjacency, A[g,i,j]=1 iff edge j->i (compute_dtype)
    invdeg_ref : (Bt, N, 1)   1 / clamped in-degree (float32)
    wcat_ref   : (L, D, 2D)   [fc_self | fc_neigh] weights, (in, out) layout (compute_dtype)
    bself_ref  : (L, 1, D)    fc_self bias (float32)
    out_ref    : (Bt, N, D)   result (float32)
    """
    Bt, N, D = h_ref.shape

    h = h_ref[...].reshape(Bt * N, D)        # (Bt*N, D) f32 — flat for the fused matmul
    a = adj_ref[...]                         # (Bt, N, N) compute_dtype, exact {0,1}
    inv_deg = invdeg_ref[...]                # (Bt, N, 1) f32

    tmp = h
    acc = h                                  # outs = [h], summed on the fly
    for l in range(num_layers):              # static unroll (layers_num small)
        w = wcat_ref[l]                      # (D, 2D) = [W_self | W_neigh]
        b = bself_ref[l].astype(jnp.float32)  # (1, D), hoisted single load

        # One MXU matmul for both projections across all Bt graphs (f32 acc).
        p = jnp.dot(tmp.astype(compute_dtype), w,
                    preferred_element_type=jnp.float32)            # (Bt*N, 2D)
        p_self = p[:, :D]                                          # lane-aligned slice
        p_neigh = p[:, D:].reshape(Bt, N, D)

        # Mean aggregation, reordered: (A @ tmp) @ W_neigh == A @ (tmp @ W_neigh).
        # Binary A on the MXU, exact f32 1/deg post-scale on the VPU.
        s = jnp.einsum('bij,bjd->bid', a, p_neigh.astype(compute_dtype),
                       preferred_element_type=jnp.float32)         # (Bt, N, D)
        neigh = (inv_deg * s).reshape(Bt * N, D)

        tmp = p_self + b + neigh             # fc_self(tmp) + fc_neigh(h_neigh)
        acc = acc + tmp * (1.0 / (1.0 + l))  # outs.append(tmp / (1 + l))

    out_ref[...] = acc.reshape(Bt, N, D).astype(out_ref.dtype)


def sagenet_forward(h, adj, w_neigh, w_self, b_self, *,
                    compute_dtype=jnp.bfloat16, graphs_per_step=None):
    """h: (B, N, D) f32; adj: (B, N, N) binary {0,1} with adj[g,i,j]=1 iff edge j->i;
    w_*: (L, D, D) in (in, out) layout; b_self: (L, 1, D)."""
    B, N, D = h.shape
    L = w_neigh.shape[0]

    # Fold graphs per grid step (amortize per-step pipeline overhead, grow the
    # projection's M dim), but keep >= 2 grid steps so "parallel" still splits
    # graphs across v7x's two TensorCores.
    if graphs_per_step is None:
        graphs_per_step = B // 2 if (B >= 2 and B % 2 == 0) else 1
    assert B % graphs_per_step == 0
    Bt = graphs_per_step
    grid_len = B // Bt

    # Fused projection weights: (L, D, 2D) = [W_self | W_neigh] along the out axis.
    w_cat = jnp.concatenate([w_self, w_neigh], axis=2).astype(compute_dtype)
    b32 = b_self.astype(jnp.float32)
    h32 = h.astype(jnp.float32)

    # Binary adjacency in the narrow compute dtype ({0,1} are exact in bf16;
    # fp8 e4m3 would also be exact on v7x) + exact f32 degree post-scale.
    adj_c = adj.astype(compute_dtype)
    deg = jnp.sum(adj.astype(jnp.float32), axis=2, keepdims=True)      # (B, N, 1)
    inv_deg = 1.0 / jnp.maximum(deg, 1.0)   # zero-in-degree clamp (DGL would raise)

    kernel = functools.partial(
        sagenet_kernel, num_layers=L, compute_dtype=compute_dtype)

    cbytes = jnp.dtype(compute_dtype).itemsize
    flops = B * L * (2 * N * D * (2 * D) + 2 * N * N * D)
    bytes_accessed = (B * N * D * 4               # h
                      + B * N * N * cbytes        # binary adjacency
                      + B * N * 4                 # 1/deg
                      + L * D * 2 * D * cbytes    # fused weights
                      + L * D * 4                 # bias
                      + B * N * D * 4)            # output

    return pl.pallas_call(
        kernel,
        out_shape=jax.ShapeDtypeStruct((B, N, D), jnp.float32),
        grid=(grid_len,),
        in_specs=[
            pl.BlockSpec((Bt, N, D), lambda b: (b, 0, 0)),         # features: Bt graphs / step
            pl.BlockSpec((Bt, N, N), lambda b: (b, 0, 0)),         # binary adjacency
            pl.BlockSpec((Bt, N, 1), lambda b: (b, 0, 0)),         # 1/deg post-scale (f32)
            pl.BlockSpec((L, D, 2 * D), lambda b: (0, 0, 0),
                         pipeline_mode=pl.Buffered(1)),            # resident weights, single-buffered
            pl.BlockSpec((L, 1, D), lambda b: (0, 0, 0),
                         pipeline_mode=pl.Buffered(1)),            # resident bias, single-buffered
        ],
        out_specs=pl.BlockSpec((Bt, N, D), lambda b: (b, 0, 0)),
        compiler_params=pltpu.CompilerParams(
            dimension_semantics=("parallel",)),                    # split grid steps across TCs (v7x)
        cost_estimate=pl.CostEstimate(
            flops=flops, transcendentals=0, bytes_accessed=bytes_accessed),
    )(h32, adj_c, inv_deg, w_cat, b32)


def sagenet_reference(h, adj_bin, w_neigh, w_self, b_self):
    """float64 numpy reference following the module's exact op order."""
    h = np.asarray(h, np.float64)
    adj = np.asarray(adj_bin, np.float64)
    wn = np.asarray(w_neigh, np.float64)
    ws = np.asarray(w_self, np.float64)
    b = np.asarray(b_self, np.float64)
    outs = []
    for g in range(h.shape[0]):
        deg = np.maximum(adj[g].sum(axis=1, keepdims=True), 1.0)   # zero-in-degree clamp
        tmp = h[g]
        acc = h[g].copy()
        for l in range(wn.shape[0]):
            neigh = (adj[g] @ tmp) / deg                  # mean aggregation
            tmp = tmp @ ws[l] + b[l] + neigh @ wn[l]      # fc_self + fc_neigh
            acc = acc + tmp / (1.0 + l)
        outs.append(acc)
    return np.stack(outs)


if __name__ == "__main__":
    B = 4     # graphs; folded 2-per-step -> grid=(2,) (keeps both v7x TCs busy)
    N = 128   # nodes per graph   (multiple of 128 -> lane-dense adjacency)
    D = 128   # SAGENet dim       (multiple of 128 -> lane-dense features/output)
    L = 2     # layers_num

    key = jax.random.PRNGKey(0)
    k_h, k_wn, k_ws, k_b = jax.random.split(key, 4)

    # Node features.
    h = jax.random.normal(k_h, (B, N, D), dtype=jnp.float32)

    # Deterministic small graphs: bidirectional ring + one extra deterministic
    # edge per node (varied per graph). Binary adjacency: A[i,j]=1 iff edge j->i.
    idx = jnp.arange(N)
    adjs = []
    for g in range(B):
        src = jnp.concatenate([idx, (idx + 1) % N, (idx * 7 + 3 + g) % N])
        dst = jnp.concatenate([(idx + 1) % N, idx, idx])
        A = jnp.zeros((N, N), dtype=jnp.float32).at[dst, src].set(1.0)
        adjs.append(A)
    adj = jnp.stack(adjs)

    # Parameters per SAGEConv.reset_parameters:
    #   fc_neigh: Linear(D, D, bias=False), Glorot-uniform, gain('relu') = sqrt(2)
    #   fc_self : Linear(D, D, bias=True),  Glorot-uniform weight, default uniform bias
    gain = math.sqrt(2.0)
    bound_w = gain * math.sqrt(6.0 / (D + D))
    w_neigh = jax.random.uniform(k_wn, (L, D, D), jnp.float32, -bound_w, bound_w)
    w_self = jax.random.uniform(k_ws, (L, D, D), jnp.float32, -bound_w, bound_w)
    bound_b = 1.0 / math.sqrt(D)
    b_self = jax.random.uniform(k_b, (L, 1, D), jnp.float32, -bound_b, bound_b)

    ref = sagenet_reference(h, adj, w_neigh, w_self, b_self)

    # f32 MXU-operand path (tight check).
    out_f32 = jax.block_until_ready(
        sagenet_forward(h, adj, w_neigh, w_self, b_self,
                        compute_dtype=jnp.float32))
    assert out_f32.shape == (B, N, D)
    assert np.allclose(np.asarray(out_f32, np.float64), ref, atol=2e-3, rtol=1e-3), \
        "f32 kernel mismatch vs. float64 reference"

    # Default bf16 MXU-operand path: binary adjacency is exact in bf16, degree
    # post-scale and accumulation are f32 -> loose norm-relative check only for
    # the bf16 weight/feature operand rounding.
    out_bf16 = jax.block_until_ready(
        sagenet_forward(h, adj, w_neigh, w_self, b_self))
    rel = (np.max(np.abs(np.asarray(out_bf16, np.float64) - ref))
           / np.max(np.abs(ref)))
    assert float(rel) < 5e-2, "bf16 kernel drifted too far from reference"

    print("KERNEL_OK")
</pallas_src>

<mosaic_0001>
module attributes {stable_mosaic.version = 11 : i64} {
  func.func @sagenet_kernel(%arg0: i32, %arg1: memref<2x128x128xf32, #tpu.memory_space<vmem>>, %arg2: memref<2x128x128xf32, #tpu.memory_space<vmem>>, %arg3: memref<2x128x1xf32, #tpu.memory_space<vmem>>, %arg4: memref<2x128x256xf32, #tpu.memory_space<vmem>>, %arg5: memref<2x1x128xf32, #tpu.memory_space<vmem>>, %arg6: memref<2x128x128xf32, #tpu.memory_space<vmem>>) attributes {dimension_semantics = [#tpu.dimension_semantics<parallel>], iteration_bounds = array<i64: 2>, scalar_prefetch = 0 : i64, scratch_operands = 0 : i64, tpu.core_type = #tpu.core_type<tc>, window_params = [{transform_indices = @transform_0, window_bounds = array<i64: 2, 128, 128>}, {transform_indices = @transform_1, window_bounds = array<i64: 2, 128, 128>}, {transform_indices = @transform_2, window_bounds = array<i64: 2, 128, 1>}, {pipeline_mode = #tpu.pipeline_mode<synchronous>, transform_indices = @transform_3, window_bounds = array<i64: 2, 128, 256>}, {pipeline_mode = #tpu.pipeline_mode<synchronous>, transform_indices = @transform_4, window_bounds = array<i64: 2, 1, 128>}, {transform_indices = @transform_5, window_bounds = array<i64: 2, 128, 128>}]} {
    %c0 = arith.constant 0 : index
    %c0_0 = arith.constant 0 : index
    %c0_1 = arith.constant 0 : index
    %0 = vector.load %arg1[%c0, %c0_0, %c0_1] : memref<2x128x128xf32, #tpu.memory_space<vmem>>, vector<2x128x128xf32>
    %1 = vector.shape_cast %0 : vector<2x128x128xf32> to vector<256x128xf32>
    %c0_2 = arith.constant 0 : index
    %c0_3 = arith.constant 0 : index
    %c0_4 = arith.constant 0 : index
    %2 = vector.load %arg2[%c0_2, %c0_3, %c0_4] : memref<2x128x128xf32, #tpu.memory_space<vmem>>, vector<2x128x128xf32>
    %c0_5 = arith.constant 0 : index
    %c0_6 = arith.constant 0 : index
    %c0_7 = arith.constant 0 : index
    %3 = vector.load %arg3[%c0_5, %c0_6, %c0_7] : memref<2x128x1xf32, #tpu.memory_space<vmem>>, vector<2x128x1xf32>
    %c0_8 = arith.constant 0 : index
    %c0_9 = arith.constant 0 : index
    %c0_10 = arith.constant 0 : index
    %4 = vector.load %arg4[%c0_8, %c0_9, %c0_10] : memref<2x128x256xf32, #tpu.memory_space<vmem>>, vector<1x128x256xf32>
    %5 = vector.shape_cast %4 : vector<1x128x256xf32> to vector<128x256xf32>
    %c0_11 = arith.constant 0 : index
    %c0_12 = arith.constant 0 : index
    %c0_13 = arith.constant 0 : index
    %6 = vector.load %arg5[%c0_11, %c0_12, %c0_13] : memref<2x1x128xf32, #tpu.memory_space<vmem>>, vector<1x1x128xf32>
    %7 = vector.shape_cast %6 : vector<1x1x128xf32> to vector<1x128xf32>
    %cst = arith.constant dense<0.000000e+00> : vector<256x256xf32>
    %8 = tpu.matmul %1, %5, %cst {dimension_numbers = #tpu.dot_dimension_numbers<[1], [0], [0], [1], [0, 0, 1, 1], [], []>} : vector<256x128xf32>, vector<128x256xf32>, vector<256x256xf32> -> vector<256x256xf32>
    %9 = vector.extract_strided_slice %8 {offsets = [0, 0], sizes = [256, 128], strides = [1, 1]} : vector<256x256xf32> to vector<256x128xf32>
    %10 = vector.extract_strided_slice %8 {offsets = [0, 128], sizes = [256, 128], strides = [1, 1]} : vector<256x256xf32> to vector<256x128xf32>
    %11 = vector.shape_cast %10 : vector<256x128xf32> to vector<2x128x128xf32>
    "tpu.trace_start"() <{level = 10 : i32, message = "bij,bjd->bid"}> : () -> ()
    %cst_14 = arith.constant dense<0.000000e+00> : vector<2x128x128xf32>
    %12 = tpu.matmul %2, %11, %cst_14 {dimension_numbers = #tpu.dot_dimension_numbers<[2], [1], [1], [2], [0, 0, 0, 1, 1, 2], [0], [0]>} : vector<2x128x128xf32>, vector<2x128x128xf32>, vector<2x128x128xf32> -> vector<2x128x128xf32>
    "tpu.trace_stop"() : () -> ()
    %13 = vector.broadcast %3 : vector<2x128x1xf32> to vector<2x128x128xf32>
    %14 = arith.mulf %13, %12 : vector<2x128x128xf32>
    %15 = vector.shape_cast %14 : vector<2x128x128xf32> to vector<256x128xf32>
    %16 = vector.broadcast %7 : vector<1x128xf32> to vector<256x128xf32>
    %17 = arith.addf %9, %16 : vector<256x128xf32>
    %18 = arith.addf %17, %15 : vector<256x128xf32>
    %cst_15 = arith.constant 1.000000e+00 : f32
    %19 = vector.broadcast %cst_15 : f32 to vector<256x128xf32>
    %20 = arith.mulf %18, %19 : vector<256x128xf32>
    %21 = arith.addf %1, %20 : vector<256x128xf32>
    %c1 = arith.constant 1 : index
    %c0_16 = arith.constant 0 : index
    %c0_17 = arith.constant 0 : index
    %22 = vector.load %arg4[%c1, %c0_16, %c0_17] : memref<2x128x256xf32, #tpu.memory_space<vmem>>, vector<1x128x256xf32>
    %23 = vector.shape_cast %22 : vector<1x128x256xf32> to vector<128x256xf32>
    %c1_18 = arith.constant 1 : index
    %c0_19 = arith.constant 0 : index
    %c0_20 = arith.constant 0 : index
    %24 = vector.load %arg5[%c1_18, %c0_19, %c0_20] : memref<2x1x128xf32, #tpu.memory_space<vmem>>, vector<1x1x128xf32>
    %25 = vector.shape_cast %24 : vector<1x1x128xf32> to vector<1x128xf32>
    %cst_21 = arith.constant dense<0.000000e+00> : vector<256x256xf32>
    %26 = tpu.matmul %18, %23, %cst_21 {dimension_numbers = #tpu.dot_dimension_numbers<[1], [0], [0], [1], [0, 0, 1, 1], [], []>} : vector<256x128xf32>, vector<128x256xf32>, vector<256x256xf32> -> vector<256x256xf32>
    %27 = vector.extract_strided_slice %26 {offsets = [0, 0], sizes = [256, 128], strides = [1, 1]} : vector<256x256xf32> to vector<256x128xf32>
    %28 = vector.extract_strided_slice %26 {offsets = [0, 128], sizes = [256, 128], strides = [1, 1]} : vector<256x256xf32> to vector<256x128xf32>
    %29 = vector.shape_cast %28 : vector<256x128xf32> to vector<2x128x128xf32>
    "tpu.trace_start"() <{level = 10 : i32, message = "bij,bjd->bid"}> : () -> ()
    %cst_22 = arith.constant dense<0.000000e+00> : vector<2x128x128xf32>
    %30 = tpu.matmul %2, %29, %cst_22 {dimension_numbers = #tpu.dot_dimension_numbers<[2], [1], [1], [2], [0, 0, 0, 1, 1, 2], [0], [0]>} : vector<2x128x128xf32>, vector<2x128x128xf32>, vector<2x128x128xf32> -> vector<2x128x128xf32>
    "tpu.trace_stop"() : () -> ()
    %31 = vector.broadcast %3 : vector<2x128x1xf32> to vector<2x128x128xf32>
    %32 = arith.mulf %31, %30 : vector<2x128x128xf32>
    %33 = vector.shape_cast %32 : vector<2x128x128xf32> to vector<256x128xf32>
    %34 = vector.broadcast %25 : vector<1x128xf32> to vector<256x128xf32>
    %35 = arith.addf %27, %34 : vector<256x128xf32>
    %36 = arith.addf %35, %33 : vector<256x128xf32>
    %cst_23 = arith.constant 5.000000e-01 : f32
    %37 = vector.broadcast %cst_23 : f32 to vector<256x128xf32>
    %38 = arith.mulf %36, %37 : vector<256x128xf32>
    %39 = arith.addf %21, %38 : vector<256x128xf32>
    %40 = vector.shape_cast %39 : vector<256x128xf32> to vector<2x128x128xf32>
    %c0_24 = arith.constant 0 : index
    %c0_25 = arith.constant 0 : index
    %c0_26 = arith.constant 0 : index
    %41 = vector.load %arg6[%c0_24, %c0_25, %c0_26] : memref<2x128x128xf32, #tpu.memory_space<vmem>>, vector<2x128x128xf32>
    tpu.vector_store %arg6[%c0_24, %c0_25, %c0_26], %40 {strides = array<i32>} : memref<2x128x128xf32, #tpu.memory_space<vmem>>, vector<2x128x128xf32>,
    return
  }
  func.func @transform_0(%arg0: i32) -> (i32, i32, i32) {
    %c0_i32 = arith.constant 0 : i32
    %c0_i32_0 = arith.constant 0 : i32
    %c0_i32_1 = arith.constant 0 : i32
    return %arg0, %c0_i32, %c0_i32_0 : i32, i32, i32
  }
  func.func @transform_1(%arg0: i32) -> (i32, i32, i32) {
    %c0_i32 = arith.constant 0 : i32
    %c0_i32_0 = arith.constant 0 : i32
    %c0_i32_1 = arith.constant 0 : i32
    return %arg0, %c0_i32, %c0_i32_0 : i32, i32, i32
  }
  func.func @transform_2(%arg0: i32) -> (i32, i32, i32) {
    %c0_i32 = arith.constant 0 : i32
    %c0_i32_0 = arith.constant 0 : i32
    %c0_i32_1 = arith.constant 0 : i32
    return %arg0, %c0_i32, %c0_i32_0 : i32, i32, i32
  }
  func.func @transform_3(%arg0: i32) -> (i32, i32, i32) {
    %c0_i32 = arith.constant 0 : i32
    %c0_i32_0 = arith.constant 0 : i32
    %c0_i32_1 = arith.constant 0 : i32
    %c0_i32_2 = arith.constant 0 : i32
    return %c0_i32, %c0_i32_0, %c0_i32_1 : i32, i32, i32
  }
  func.func @transform_4(%arg0: i32) -> (i32, i32, i32) {
    %c0_i32 = arith.constant 0 : i32
    %c0_i32_0 = arith.constant 0 : i32
    %c0_i32_1 = arith.constant 0 : i32
    %c0_i32_2 = arith.constant 0 : i32
    return %c0_i32, %c0_i32_0, %c0_i32_1 : i32, i32, i32
  }
  func.func @transform_5(%arg0: i32) -> (i32, i32, i32) {
    %c0_i32 = arith.constant 0 : i32
    %c0_i32_0 = arith.constant 0 : i32
    %c0_i32_1 = arith.constant 0 : i32
    return %arg0, %c0_i32, %c0_i32_0 : i32, i32, i32
  }
}

</mosaic_0001>

<bundles_post_ra>
// kernel: tpu_custom_call.1
= control target key start
LH: loop header
LB: loop body
LE: loop exit
PB: predicated region body
PF: predicated region fallthrough
CT: control target
= control target key end

     0   :  { %10 = vsyncpa [#allocation3], 0  ;;  %s4128_s0 = inlined_call_operand.vmem [shape: f32[4,128,128], index: 0, kind: input, shape index: {}]   ;;  %s4129_s1 = inlined_call_operand.hbm [shape: f32[4,128,128], index: 1, kind: input, shape index: {}]   ;;  %s4130_s2 = inlined_call_operand.vmem [shape: f32[4,128,1], index: 2, kind: input, shape index: {}]   ;;  %s4131_s3 = inlined_call_operand.hbm [shape: f32[2,128,256], index: 3, kind: input, shape index: {}]   ;;  %s4132_s4 = inlined_call_operand.vmem [shape: f32[2,1,128], index: 4, kind: input, shape index: {}]   ;;  %s4133_s5 = inlined_call_operand.hbm [shape: f32[4,128,128], index: 5, kind: output, shape index: {}]  }
   0x1   :  { %12 = vsyncpa [#allocation3 + $0x1], 0 }
   0x2   :  { %13 = vsyncpa [#allocation6], 0 }
   0x3   :  { %14 = vsyncpa [#allocation4], 0 }
   0x4   :  { %16 = vsyncpa [#allocation4 + $0x1], 0  ;;  %s3030_s18 = smov 0   ;;  %s3032_s19 = smov 0  }
   0x5   :  { %s3034_s20 = smov 0   ;;  %s3036_s21 = smov 0  }
   0x6 LB: > { %s3051_s22 = sadd.s32 4294967295, %s2987_s21   ;;  %s2183_s23 = sadd.s32 4294967294, %s2987_s21   ;;  %s2987_s21 = sphi %s3036_s21, %s4345_s21   ;;  %s2983_s20 = sphi %s3034_s20, %s4344_s20   ;;  %s2979_s19 = sphi %s3032_s19, %s4343_s19   ;;  %s2975_s18 = sphi %s3030_s18, %s4342_s18  }
   0x7   : > { %p68_p0 = scmp.ne.s32.totalorder %s2979_s19, %s2975_s18  ;;  %p4134_p1 = scmp.eq.s32.totalorder %s3051_s22, 0 }
   0x8   : > { %p166_p3 = scmp.eq.s32.totalorder %s2183_s23, 1  ;;  %p2184_p5 = scmp.ge.s32.totalorder %s2987_s21, 1 }
   0x9   : > { %p3060_p4 = por %p4134_p1, %p68_p0  ;;  %p173_p7 = scmp.lt.s32.totalorder %s2987_s21, 3 }
   0xa   : > { %p3065_p6 = por %p166_p3, %p68_p0  ;;  %s2989_s27 = smov [#allocation5]  }
   0xb   : > { %s4196_s24 = scalar_select %p3060_p4, 1, 0 }
   0xc   : > { %s4197_s25 = scalar_select %p3065_p6, 1, 0 }
   0xd   : > { %p3070_p8 = pnand %p2184_p5, %p173_p7  ;;  %s185_s28 = sshll.u32 %s2989_s27, 4  ;;  %s3074_s28 = int_to_ptr.vmem [resolvable:$true] %s185_s28 }
   0xe   : > { %s3086_s30 = sadd.s32 1, %s2987_s21   ;;  %s55_s6 = sadd.s32 1, %s2983_s20 }
   0xf   : > { %s4198_s26 = scalar_select %p3070_p8, 1, 0 }
  0x10   : > { %p2768_p9 = pneg %p3070_p8  ;;  %s52_s7 = ssub.s32 %s2987_s21, %s3086_s30 }
  0x11   : > { %s2859_s10 = scalar_lea.hbm %s4131_s3, 8192 }
  0x12   : > { %p3081_p11 = pnand %p2768_p9, %p4134_p1  ;;  %p2860_p12 = scmp.ne.s32.totalorder %s4131_s3, %s2859_s10 }
  0x13   : > { %p2866_p5 = scmp.lt.u32.totalorder %s2859_s10, %s4131_s3 }
  0x14   : > { %p2861_p13 = pneg %p3081_p11 }
  0x16   : > { %p2862_p0 = pnand %p2861_p13, %p2860_p12 }
  0x18   : > { %p2863_p3 = pneg %p2862_p0 }
  0x1a   : > { %p2868_p7 = pnand %p2866_p5, %p2863_p3 }
  0x1c   : > { %2871 = shalt.err (!%p2868_p7)
}
  0x1d   : > { %s2872_s15 = scalar_lea.vmem %s3074_s28, 8192  ;;  %p2880_p2 = scmp.lt.s32.totalorder %s3074_s28, %s3074_s28 }
  0x1e   : > { %p2873_p9 = scmp.ne.s32.totalorder %s3074_s28, %s2872_s15  ;;  %p2881_p6 = scmp.lt.s32.totalorder %s2872_s15, %s2872_s15 }
  0x20   : > { %p2875_p10 = pnand %p2873_p9, %p2861_p13  ;;  %p2882_p4 = por %p2881_p6, %p2880_p2 }
  0x22   : > { %p2876_p1 = pneg %p2875_p10 }
  0x24   : > { %p2883_p8 = pnand %p2882_p4, %p2876_p1 }
  0x26   : > { %2886 = shalt.err (!%p2883_p8)
}
  0x27   : > { %s2990_s16 = smov 256   ;;  %s2991_s17 = smov 16  }
  0x28   : > { %2771 = dma.hbm_to_vmem [thread:$0]  (!%p3081_p11), %s4131_s3, 8192, %s3074_s28, [#allocation6], %s2990_s16, %s2990_s16, %s2991_s17  }
  0x29   : > { %p53_p2 = scmp.eq.s32.totalorder %s52_s7, 0  ;;  %p62_p1 = scmp.ne.s32.totalorder %s2983_s20, %s2979_s19 }
  0x2a   : > { %p63_p4 = scmp.eq.s32.totalorder %s2987_s21, 0  ;;  %p2781_p6 = scmp.lt.s32.totalorder %s2987_s21, 2 }
  0x2b   : > { %s3117_s8 = scalar_select %p53_p2, %s2983_s20, %s55_s6  }
  0x2c   : > { %p64_p8 = por %p63_p4, %p62_p1  ;;  %p4200_p10 = scmp.eq.s32.totalorder %s3051_s22, 1 }
  0x2d   : > { %s212_s10 = sand.u32 1, %s2983_s20   ;;  %s2211_s11 = sshll.u32 %s2987_s21, 12 }
  0x2e   : > { %p3121_p12 = por %p4200_p10, %p62_p1  ;;  %s2187_s12 = sshll.u32 %s212_s10, 8 }
  0x2f   : > { %s3130_s14 = scalar_lea.hbm %s4129_s1, %s2211_s11  ;;  %s216_s28 = scalar_lea.vmem [#allocation2], %s2187_s12 }
  0x30   : > { %s224_s6 = sshll.u32 %s216_s28, 4  ;;  %p3132_p11 = pnand %p2781_p6, %p64_p8  ;;  %s3136_s6 = int_to_ptr.vmem [resolvable:$true] %s224_s6 }
  0x31   : > { %s3138_s15 = scalar_lea.sflag [#allocation3], %s212_s10  ;;  %s2887_s16 = scalar_lea.hbm %s3130_s14, 4096 }
  0x32   : > { %p2888_p13 = scmp.ne.s32.totalorder %s3130_s14, %s2887_s16  ;;  %p2889_p0 = pneg %p3132_p11 }
  0x33   : > { %s2892_s27 = scalar_lea.hbm %s4129_s1, 8192  ;;  %p2893_p7 = scmp.lt.u32.totalorder %s3130_s14, %s4129_s1 }
  0x34   : > { %p2890_p3 = pnand %p2889_p0, %p2888_p13  ;;  %p2894_p9 = scmp.lt.u32.totalorder %s2892_s27, %s2887_s16 }
  0x35   : > { %p2896_p1 = scmp.lt.u32.totalorder %s2887_s16, %s3130_s14 }
  0x36   : > { %p2891_p5 = pneg %p2890_p3  ;;  %p2895_p2 = por %p2894_p9, %p2893_p7 }
  0x38   : > { %p2897_p4 = por %p2896_p1, %p2895_p2 }
  0x3a   : > { %p2898_p6 = pnand %p2897_p4, %p2891_p5 }
  0x3c   : > { %2901 = shalt.err (!%p2898_p6)
}
  0x3d   : > { %s2902_s10 = scalar_lea.vmem %s3136_s6, 4096  ;;  %s2992_s29 = smov [#allocation2]  }
  0x3e   : > { %p2903_p8 = scmp.ne.s32.totalorder %s3136_s6, %s2902_s10  ;;  %s2907_s13 = sshll.u32 %s2992_s29, 4  ;;  %s2908_s13 = int_to_ptr.vmem [resolvable:$false] %s2907_s13 }
  0x3f   : > { %s2909_s28 = scalar_lea.vmem %s2908_s13, 8192  ;;  %p2910_p3 = scmp.lt.s32.totalorder %s3136_s6, %s2908_s13 }
  0x40   : > { %p2905_p10 = pnand %p2903_p8, %p2889_p0  ;;  %p2911_p7 = scmp.lt.s32.totalorder %s2909_s28, %s2902_s10 }
  0x42   : > { %p2906_p13 = pneg %p2905_p10  ;;  %p2912_p9 = por %p2911_p7, %p2910_p3 }
  0x44   : > { %p2913_p2 = pnand %p2912_p9, %p2906_p13 }
  0x46   : > { %2916 = shalt.err (!%p2913_p2)
}
  0x47   : > { %s2993_s16 = smov 128   ;;  %s2994_s17 = smov 8  }
  0x48   : > { %2775 = dma.hbm_to_vmem [thread:$0]  (!%p3132_p11), %s3130_s14, 4096, %s3136_s6, %s3138_s15, %s2993_s16, %s2993_s16, %s2994_s17  }
  0x49   : > { %p4203_p0 = scmp.ne.s32.totalorder %s4198_s26, 0 }
  0x4b   : > { %246 = sbr.rel (%p4203_p0) target bundleno = 1227 (0x4cb), region = 40 }
  0x52   : > { %s3169_s23 = sand.u32 1, %s2979_s19   ;;  %p4204_p5 = scmp.ne.s32.totalorder %s4196_s24, 0 }
  0x53   : > { %s2192_s27 = sshll.u32 %s3169_s23, 8  ;;  %s249_s11 = scalar_lea.sflag [#allocation3], %s3169_s23 }
  0x54   : > { %s3175_s12 = scalar_lea.vmem [#allocation2], %s2192_s27 }
  0x55   : > { %2962 = dma.done.wait (%p4204_p5), %s249_s11, 4096  }
  0x56   : > { %2964 = vsyncadd (%p4204_p5), %s249_s11, 4294963200  ;;  %p4205_p11 = scmp.eq.s32.totalorder %s3051_s22, 0 }
  0x58   : > { %2966 = dma.done.wait (%p4205_p11), [#allocation6], 8192   ;;  %p4206_p1 = pmov %p4205_p11 }
  0x59   : > { %v4137_v0 = vmov 0.0   ;;  %v408_v1 = vld [vmem:[#allocation5 + $0x8] sm:$0xff]  ;;  %v410_v2 = vld [vmem:[#allocation5 + $0x18] sm:$0xff]  ;;  %v407_v3 = vld [vmem:[#allocation5] sm:$0xff]  ;;  %s2195_s24 = sshll.u32 %s3051_s22, 1  ;;  %s3903_s11 = scalar_lea.vmem [#allocation7], %s2192_s27 }
  0x5a   : > { %2968 = vsyncadd (%p4206_p1), [#allocation6], 4294959104  ;;  %504 = vmatprep.mubr.f32.mxu0 %v4137_v0  ;;  %v2568_v4 = vpack.c.bf16 %v410_v2, %v408_v1  ;;  %v409_v5 = vld [vmem:[#allocation5 + $0x10] sm:$0xff]  ;;  %v412_v6 = vld [vmem:[#allocation5 + $0x28] sm:$0xff]  ;;  %p296_p4 = scmp.lt.s32.totalorder %s2195_s24, 3  ;;  %s2215_s27 = sshll.u32 %s3051_s22, 12 }
  0x5b   : > { %v414_v7 = vld [vmem:[#allocation5 + $0x38] sm:$0xff]  ;;  %v2570_v8 = vpack.c.bf16 %v409_v5, %v407_v3  ;;  %v411_v10 = vld [vmem:[#allocation5 + $0x20] sm:$0xff]  ;;  %v413_v11 = vld [vmem:[#allocation5 + $0x30] sm:$0xff]  ;;  %s4080_s14 = scalar_lea.hbm %s4133_s5, %s2215_s27  ;;  %s2062_s22 = scalar_lea.sflag [#allocation4], %s3169_s23 }
  0x5c   : > { %v2572_v9 = vpack.c.bf16 %v414_v7, %v412_v6  ;;  %v416_v12 = vld [vmem:[#allocation5 + $0x48] sm:$0xff]  ;;  %2569 = vmatprep.subr.bf16.mxu0 %v2568_v4  ;;  %v418_v13 = vld [vmem:[#allocation5 + $0x58] sm:$0xff]  ;;  %v2574_v14 = vpack.c.bf16 %v413_v11, %v411_v10  ;;  %v415_v16 = vld [vmem:[#allocation5 + $0x40] sm:$0xff]  ;;  %s4347_s24 = smov (!%p296_p4, %s2195_s24), 3 }
  0x5d   : > { %2571 = vmatpush1.bf16.msra.mxu0 %v2570_v8  ;;  %v2576_v15 = vpack.c.bf16 %v418_v13, %v416_v12  ;;  %v417_v17 = vld [vmem:[#allocation5 + $0x50] sm:$0xff]  ;;  %v420_v18 = vld [vmem:[#allocation5 + $0x68] sm:$0xff]  ;;  %v422_v19 = vld [vmem:[#allocation5 + $0x78] sm:$0xff]  ;;  %s2212_s26 = sshll.u32 %s4347_s24, 7 }
  0x5e   : > { %2573 = vmatprep.subr.bf16.mxu0 %v2572_v9  ;;  %v2578_v20 = vpack.c.bf16 %v417_v17, %v415_v16  ;;  %v2580_v21 = vpack.c.bf16 %v422_v19, %v420_v18  ;;  %v419_v22 = vld [vmem:[#allocation5 + $0x60] sm:$0xff]  ;;  %v421_v23 = vld [vmem:[#allocation5 + $0x70] sm:$0xff]  ;;  %v424_v24 = vld [vmem:[#allocation5 + $0x88] sm:$0xff]  ;;  %s3195_s7 = scalar_lea.vmem %s4128_s0, %s2212_s26  ;;  %v2996_v19 = vmov 0   ;;  %s3266_s29 = scalar_lea.vmem %s4130_s2, %s2212_s26 }
  0x5f   : > { %v426_v25 = vld [vmem:[#allocation5 + $0x98] sm:$0xff]  ;;  %v2582_v26 = vpack.c.bf16 %v421_v23, %v419_v22  ;;  %v423_v28 = vld [vmem:[#allocation5 + $0x80] sm:$0xff]  ;;  %v425_v29 = vld [vmem:[#allocation5 + $0x90] sm:$0xff]  ;;  %2825 = vset.pattern.permute.xlu0 %v2996_v19  ;;  %2826 = vset.pattern.permute.xlu1 %v2996_v19 }
  0x60   : > { %v2584_v27 = vpack.c.bf16 %v426_v25, %v424_v24  ;;  %v428_v30 = vld [vmem:[#allocation5 + $0xa8] sm:$0xff]  ;;  %v430_v31 = vld [vmem:[#allocation5 + $0xb8] sm:$0xff]  ;;  %v2586_v32 = vpack.c.bf16 %v425_v29, %v423_v28  ;;  %v427_v34 = vld [vmem:[#allocation5 + $0xa0] sm:$0xff] }
  0x61   : > { %2575 = vmatpush1.bf16.msra.mxu0 %v2574_v14  ;;  %v2588_v33 = vpack.c.bf16 %v430_v31, %v428_v30  ;;  %v429_v35 = vld [vmem:[#allocation5 + $0xb0] sm:$0xff]  ;;  %v432_v36 = vld [vmem:[#allocation5 + $0xc8] sm:$0xff]  ;;  %v434_v37 = vld [vmem:[#allocation5 + $0xd8] sm:$0xff] }
  0x62   : > { %2577 = vmatprep.subr.bf16.mxu0 %v2576_v15  ;;  %v2590_v38 = vpack.c.bf16 %v429_v35, %v427_v34  ;;  %v2592_v39 = vpack.c.bf16 %v434_v37, %v432_v36  ;;  %v431_v40 = vld [vmem:[#allocation5 + $0xc0] sm:$0xff]  ;;  %v433_v41 = vld [vmem:[#allocation5 + $0xd0] sm:$0xff]  ;;  %v436_v42 = vld [vmem:[#allocation5 + $0xe8] sm:$0xff] }
  0x63   : > { %v438_v43 = vld [vmem:[#allocation5 + $0xf8] sm:$0xff]  ;;  %v2594_v44 = vpack.c.bf16 %v433_v41, %v431_v40  ;;  %v435_v46 = vld [vmem:[#allocation5 + $0xe0] sm:$0xff]  ;;  %v437_v47 = vld [vmem:[#allocation5 + $0xf0] sm:$0xff] }
  0x64   : > { %v2596_v45 = vpack.c.bf16 %v438_v43, %v436_v42  ;;  %v2598_v48 = vpack.c.bf16 %v437_v47, %v435_v46  ;;  %v311_v49 = vld [vmem:[%s3195_s7] sm:$0xff]  ;;  %v312_v50 = vld [vmem:[%s3195_s7 + $0x8] sm:$0xff]  ;;  %v313_v51 = vld [vmem:[%s3195_s7 + $0x10] sm:$0xff] }
  0x65   : > { %2579 = vmatpush1.bf16.msra.mxu0 %v2578_v20  ;;  %v314_v52 = vld [vmem:[%s3195_s7 + $0x18] sm:$0xff]  ;;  %v315_v53 = vld [vmem:[%s3195_s7 + $0x20] sm:$0xff]  ;;  %v316_v54 = vld [vmem:[%s3195_s7 + $0x28] sm:$0xff] }
  0x66   : > { %2581 = vmatprep.subr.bf16.mxu0 %v2580_v21  ;;  %v317_v55 = vld [vmem:[%s3195_s7 + $0x30] sm:$0xff]  ;;  %v318_v56 = vld [vmem:[%s3195_s7 + $0x38] sm:$0xff]  ;;  %v319_v57 = vld [vmem:[%s3195_s7 + $0x40] sm:$0xff] }
  0x67   : > { %v320_v58 = vld [vmem:[%s3195_s7 + $0x48] sm:$0xff]  ;;  %v321_v59 = vld [vmem:[%s3195_s7 + $0x50] sm:$0xff]  ;;  %v322_v60 = vld [vmem:[%s3195_s7 + $0x58] sm:$0xff] }
  0x68   : > { %v323_v61 = vld [vmem:[%s3195_s7 + $0x60] sm:$0xff]  ;;  %v324_v62 = vld [vmem:[%s3195_s7 + $0x68] sm:$0xff]  ;;  %v325_v63 = vld [vmem:[%s3195_s7 + $0x70] sm:$0xff] }
  0x69   : > { %2583 = vmatpush1.bf16.msra.mxu0 %v2582_v26  ;;  %v326_v1 = vld [vmem:[%s3195_s7 + $0x78] sm:$0xff]  ;;  %v327_v2 = vld [vmem:[%s3195_s7 + $0x80] sm:$0xff]  ;;  %v328_v3 = vld [vmem:[%s3195_s7 + $0x88] sm:$0xff] }
  0x6a   : > { %2585 = vmatprep.subr.bf16.mxu0 %v2584_v27  ;;  %v329_v4 = vld [vmem:[%s3195_s7 + $0x90] sm:$0xff]  ;;  %v330_v5 = vld [vmem:[%s3195_s7 + $0x98] sm:$0xff]  ;;  %v331_v6 = vld [vmem:[%s3195_s7 + $0xa0] sm:$0xff] }
  0x6b   : > { %v332_v7 = vld [vmem:[%s3195_s7 + $0xa8] sm:$0xff]  ;;  %v333_v8 = vld [vmem:[%s3195_s7 + $0xb0] sm:$0xff]  ;;  %v334_v9 = vld [vmem:[%s3195_s7 + $0xb8] sm:$0xff] }
  0x6c   : > { %v335_v10 = vld [vmem:[%s3195_s7 + $0xc0] sm:$0xff]  ;;  %v336_v11 = vld [vmem:[%s3195_s7 + $0xc8] sm:$0xff]  ;;  %v337_v12 = vld [vmem:[%s3195_s7 + $0xd0] sm:$0xff] }
  0x6d   : > { %2587 = vmatpush1.bf16.msra.mxu0 %v2586_v32  ;;  %v338_v13 = vld [vmem:[%s3195_s7 + $0xd8] sm:$0xff]  ;;  %v339_v14 = vld [vmem:[%s3195_s7 + $0xe0] sm:$0xff]  ;;  %v340_v15 = vld [vmem:[%s3195_s7 + $0xe8] sm:$0xff] }
  0x6e   : > { %2589 = vmatprep.subr.bf16.mxu0 %v2588_v33  ;;  %v341_v16 = vld [vmem:[%s3195_s7 + $0xf0] sm:$0xff]  ;;  %v342_v17 = vld [vmem:[%s3195_s7 + $0xf8] sm:$0xff]  ;;  %v343_v18 = vld [vmem:[%s3175_s12] sm:$0xff] }
  0x6f   : > { %2376 = vmatprep.mubr.f32.mxu1 %v343_v18  ;;  %v375_v20 = vld [vmem:[%s3266_s29] sm:$0xff]  ;;  %v376_v21 = vld [vmem:[%s3266_s29 + $0x8] sm:$0xff]  ;;  %v377_v22 = vld [vmem:[%s3266_s29 + $0x10] sm:$0xff] }
  0x70   : > { %989 = vperm.xlu0 %2825, %v375_v20   ;;  %v379_v23 = vld [vmem:[%s3266_s29 + $0x20] sm:$0xff]  ;;  %999 = vperm.xlu1 %2826, %v377_v22   ;;  %v378_v24 = vld [vmem:[%s3266_s29 + $0x18] sm:$0xff]  ;;  %v381_v25 = vld [vmem:[%s3266_s29 + $0x30] sm:$0xff] }
  0x71   : > { %2591 = vmatpush1.bf16.msra.mxu0 %v2590_v38  ;;  %v383_v26 = vld [vmem:[%s3266_s29 + $0x40] sm:$0xff]  ;;  %v380_v27 = vld [vmem:[%s3266_s29 + $0x28] sm:$0xff]  ;;  %v385_v28 = vld [vmem:[%s3266_s29 + $0x50] sm:$0xff] }
  0x72   : > { %2593 = vmatprep.subr.bf16.mxu0 %v2592_v39  ;;  %v382_v29 = vld [vmem:[%s3266_s29 + $0x38] sm:$0xff]  ;;  %v387_v30 = vld [vmem:[%s3266_s29 + $0x60] sm:$0xff]  ;;  %v384_v31 = vld [vmem:[%s3266_s29 + $0x48] sm:$0xff] }
  0x73   : > { %v389_v32 = vld [vmem:[%s3266_s29 + $0x70] sm:$0xff]  ;;  %v386_v33 = vld [vmem:[%s3266_s29 + $0x58] sm:$0xff]  ;;  %v391_v34 = vld [vmem:[%s3266_s29 + $0x80] sm:$0xff] }
  0x74   : > { %994 = vperm.xlu0 %2825, %v376_v21   ;;  %1004 = vperm.xlu1 %2826, %v378_v24   ;;  %v388_v35 = vld [vmem:[%s3266_s29 + $0x68] sm:$0xff]  ;;  %v393_v37 = vld [vmem:[%s3266_s29 + $0x90] sm:$0xff]  ;;  %v390_v38 = vld [vmem:[%s3266_s29 + $0x78] sm:$0xff] }
  0x75   : > { %2595 = vmatpush1.bf16.msra.mxu0 %v2594_v44  ;;  %v395_v41 = vld [vmem:[%s3266_s29 + $0xa0] sm:$0xff]  ;;  %v392_v42 = vld [vmem:[%s3266_s29 + $0x88] sm:$0xff]  ;;  %v397_v46 = vld [vmem:[%s3266_s29 + $0xb0] sm:$0xff] }
  0x76   : > { %2597 = vmatprep.subr.bf16.mxu0 %v2596_v45  ;;  %v394_v47 = vld [vmem:[%s3266_s29 + $0x98] sm:$0xff] }
  0x78   : > { %1009 = vperm.xlu0 %2825, %v379_v23   ;;  %1014 = vperm.xlu1 %2826, %v380_v27  }
  0x79   : > { %2599 = vmatpush1.bf16.msra.mxu0 %v2598_v48 }
  0x7c   : > { %505 = vmatmul.mubr.f32.vlgmr.msra.gmra.mrb[0].mxu0 %v311_v49  ;;  %1019 = vperm.xlu0 %2825, %v381_v25  }
  0x7d   : > { %510 = vmatprep.mubr.f32.mxu0 %v4137_v0  ;;  %1024 = vperm.xlu1 %2826, %v382_v29  }
  0x80   : > { %511 = vmatmul.mubr.f32.gmra.mrb[2].mxu0 %v312_v50  ;;  %1029 = vperm.xlu0 %2825, %v383_v26   ;;  %v399_v50 = vld [vmem:[%s3266_s29 + $0xc0] sm:$0xff] }
  0x81   : > { %516 = vmatprep.mubr.f32.mxu0 %v4137_v0  ;;  %1034 = vperm.xlu1 %2826, %v384_v31  }
  0x84   : > { %517 = vmatmul.mubr.f32.gmra.mrb[4].mxu0 %v313_v51  ;;  %1039 = vperm.xlu0 %2825, %v385_v28   ;;  %v396_v51 = vld [vmem:[%s3266_s29 + $0xa8] sm:$0xff] }
  0x85   : > { %522 = vmatprep.mubr.f32.mxu0 %v4137_v0  ;;  %1044 = vperm.xlu1 %2826, %v386_v33  }
  0x88   : > { %523 = vmatmul.mubr.f32.gmra.mrb[6].mxu0 %v314_v52  ;;  %1049 = vperm.xlu0 %2825, %v387_v30   ;;  %v3335_v30 = vld [vmem:[%s3175_s12 + $0x8] sm:$0xff] }
  0x89   : > { %528 = vmatprep.mubr.f32.mxu0 %v4137_v0  ;;  %1054 = vperm.xlu1 %2826, %v388_v35  }
  0x8c   : > { %529 = vmatmul.mubr.f32.gmra.mrb[8].mxu0 %v315_v53  ;;  %1059 = vperm.xlu0 %2825, %v389_v32   ;;  %v3338_v32 = vld [vmem:[%s3175_s12 + $0x10] sm:$0xff] }
  0x8d   : > { %534 = vmatprep.mubr.f32.mxu0 %v4137_v0  ;;  %1064 = vperm.xlu1 %2826, %v390_v38  }
  0x90   : > { %535 = vmatmul.mubr.f32.gmra.mrb[10].mxu0 %v316_v54  ;;  %1069 = vperm.xlu0 %2825, %v391_v34   ;;  %v3345_v34 = vld [vmem:[%s3175_s12 + $0x18] sm:$0xff] }
  0x91   : > { %540 = vmatprep.mubr.f32.mxu0 %v4137_v0  ;;  %1074 = vperm.xlu1 %2826, %v392_v42  }
  0x94   : > { %541 = vmatmul.mubr.f32.gmra.mrb[12].mxu0 %v317_v55  ;;  %1079 = vperm.xlu0 %2825, %v393_v37   ;;  %v401_v55 = vld [vmem:[%s3266_s29 + $0xd0] sm:$0xff]  ;;  %v3348_v37 = vld [vmem:[%s3175_s12 + $0x20] sm:$0xff] }
  0x95   : > { %546 = vmatprep.mubr.f32.mxu0 %v4137_v0  ;;  %1084 = vperm.xlu1 %2826, %v394_v47  }
  0x98   : > { %547 = vmatmul.mubr.f32.gmra.mrb[14].mxu0 %v318_v56  ;;  %1089 = vperm.xlu0 %2825, %v395_v41   ;;  %v398_v56 = vld [vmem:[%s3266_s29 + $0xb8] sm:$0xff]  ;;  %v3355_v41 = vld [vmem:[%s3175_s12 + $0x28] sm:$0xff] }
  0x99   : > { %552 = vmatprep.mubr.f32.mxu0 %v4137_v0  ;;  %1094 = vperm.xlu1 %2826, %v396_v51  }
  0x9c   : > { %553 = vmatmul.mubr.f32.gmra.mrb[16].mxu0 %v319_v57  ;;  %1099 = vperm.xlu0 %2825, %v397_v46   ;;  %v3365_v46 = vld [vmem:[%s3175_s12 + $0x38] sm:$0xff] }
  0x9d   : > { %558 = vmatprep.mubr.f32.mxu0 %v4137_v0  ;;  %1104 = vperm.xlu1 %2826, %v398_v56  }
  0xa0   : > { %559 = vmatmul.mubr.f32.gmra.mrb[18].mxu0 %v320_v58  ;;  %1109 = vperm.xlu0 %2825, %v399_v50  }
  0xa1   : > { %564 = vmatprep.mubr.f32.mxu0 %v4137_v0 }
  0xa4   : > { %565 = vmatmul.mubr.f32.gmra.mrb[20].mxu0 %v321_v59  ;;  %1119 = vperm.xlu0 %2825, %v401_v55   ;;  %v403_v59 = vld [vmem:[%s3266_s29 + $0xe0] sm:$0xff]  ;;  %v3378_v55 = vld [vmem:[%s3175_s12 + $0x50] sm:$0xff] }
  0xa5   : > { %570 = vmatprep.mubr.f32.mxu0 %v4137_v0 }
  0xa8   : > { %571 = vmatmul.mubr.f32.gmra.mrb[22].mxu0 %v322_v60  ;;  %v400_v60 = vld [vmem:[%s3266_s29 + $0xc8] sm:$0xff]  ;;  %1129 = vperm.xlu0 %2825, %v403_v59  }
  0xa9   : > { %576 = vmatprep.mubr.f32.mxu0 %v4137_v0  ;;  %1114 = vperm.xlu1 %2826, %v400_v60   ;;  %v3388_v60 = vld [vmem:[%s3175_s12 + $0x60] sm:$0xff] }
  0xac   : > { %577 = vmatmul.mubr.f32.gmra.mrb[24].mxu0 %v323_v61 }
  0xad   : > { %582 = vmatprep.mubr.f32.mxu0 %v4137_v0 }
  0xb0   : > { %583 = vmatmul.mubr.f32.gmra.mrb[26].mxu0 %v324_v62 }
  0xb1   : > { %588 = vmatprep.mubr.f32.mxu0 %v4137_v0 }
  0xb4   : > { %589 = vmatmul.mubr.f32.gmra.mrb[28].mxu0 %v325_v63 }
  0xb5   : > { %594 = vmatprep.mubr.f32.mxu0 %v4137_v0 }
  0xb8   : > { %595 = vmatmul.mubr.f32.gmra.mrb[30].mxu0 %v326_v1  ;;  %v405_v1 = vld [vmem:[%s3266_s29 + $0xf0] sm:$0xff] }
  0xb9   : > { %600 = vmatprep.mubr.f32.mxu0 %v4137_v0  ;;  %1139 = vperm.xlu0 %2825, %v405_v1   ;;  %v3395_v1 = vld [vmem:[%s3175_s12 + $0x68] sm:$0xff] }
  0xba   : > { %4207 = vst [vmem:[#allocation11_spill] sm:$0xff] %v3395_v1 }
  0xbc   : > { %601 = vmatmul.mubr.f32.gmra.mrb[32].mxu0 %v327_v2  ;;  %v402_v2 = vld [vmem:[%s3266_s29 + $0xd8] sm:$0xff] }
  0xbd   : > { %606 = vmatprep.mubr.f32.mxu0 %v4137_v0  ;;  %1124 = vperm.xlu1 %2826, %v402_v2  }
  0xc0   : > { %607 = vmatmul.mubr.f32.gmra.mrb[34].mxu0 %v328_v3 }
  0xc1   : > { %612 = vmatprep.mubr.f32.mxu0 %v4137_v0 }
  0xc4   : > { %613 = vmatmul.mubr.f32.gmra.mrb[36].mxu0 %v329_v4 }
  0xc5   : > { %618 = vmatprep.mubr.f32.mxu0 %v4137_v0 }
  0xc8   : > { %619 = vmatmul.mubr.f32.gmra.mrb[38].mxu0 %v330_v5  ;;  %v404_v5 = vld [vmem:[%s3266_s29 + $0xe8] sm:$0xff] }
  0xc9   : > { %624 = vmatprep.mubr.f32.mxu0 %v4137_v0  ;;  %1134 = vperm.xlu1 %2826, %v404_v5  }
  0xcc   : > { %625 = vmatmul.mubr.f32.gmra.mrb[40].mxu0 %v331_v6 }
  0xcd   : > { %630 = vmatprep.mubr.f32.mxu0 %v4137_v0 }
  0xd0   : > { %631 = vmatmul.mubr.f32.gmra.mrb[42].mxu0 %v332_v7 }
  0xd1   : > { %636 = vmatprep.mubr.f32.mxu0 %v4137_v0 }
  0xd4   : > { %637 = vmatmul.mubr.f32.gmra.mrb[44].mxu0 %v333_v8 }
  0xd5   : > { %642 = vmatprep.mubr.f32.mxu0 %v4137_v0 }
  0xd8   : > { %643 = vmatmul.mubr.f32.gmra.mrb[46].mxu0 %v334_v9  ;;  %v406_v9 = vld [vmem:[%s3266_s29 + $0xf8] sm:$0xff] }
  0xd9   : > { %648 = vmatprep.mubr.f32.mxu0 %v4137_v0  ;;  %1144 = vperm.xlu1 %2826, %v406_v9  }
  0xdc   : > { %649 = vmatmul.mubr.f32.gmra.mrb[48].mxu0 %v335_v10 }
  0xdd   : > { %654 = vmatprep.mubr.f32.mxu0 %v4137_v0 }
  0xe0   : > { %655 = vmatmul.mubr.f32.gmra.mrb[50].mxu0 %v336_v11 }
  0xe1   : > { %660 = vmatprep.mubr.f32.mxu0 %v4137_v0 }
  0xe4   : > { %661 = vmatmul.mubr.f32.gmra.mrb[52].mxu0 %v337_v12 }
  0xe5   : > { %666 = vmatprep.mubr.f32.mxu0 %v4137_v0 }
  0xe8   : > { %667 = vmatmul.mubr.f32.gmra.mrb[54].mxu0 %v338_v13 }
  0xe9   : > { %672 = vmatprep.mubr.f32.mxu0 %v4137_v0 }
  0xec   : > { %673 = vmatmul.mubr.f32.gmra.mrb[56].mxu0 %v339_v14 }
  0xed   : > { %678 = vmatprep.mubr.f32.mxu0 %v4137_v0 }
  0xf0   : > { %679 = vmatmul.mubr.f32.gmra.mrb[58].mxu0 %v340_v15 }
  0xf1   : > { %684 = vmatprep.mubr.f32.mxu0 %v4137_v0 }
  0xf4   : > { %685 = vmatmul.mubr.f32.gmra.mrb[60].mxu0 %v341_v16 }
  0xf5   : > { %690 = vmatprep.mubr.f32.mxu0 %v4137_v0  ;;  %v1288_v0 = vld [vmem:[#allocation5 + $0x130] sm:$0xff] }
  0xf8   : > { %691 = vmatmul.mubr.f32.gmra.mrb[62].mxu0 %v342_v17 }
  0xf9   : > { %2488 = vmatprep.mubr.f32.mxu0 %v343_v18 }
 0x14f   : > { %v3284_v36 = vpop.f32.mrb[0].mxu0 }
 0x150   : > { %v508_v39 = vpop.f32.mrb[1].mxu0 }
 0x153   : > { %v3288_v40 = vpop.f32.mrb[2].mxu0 }
 0x154   : > { %v514_v43 = vpop.f32.mrb[3].mxu0 }
 0x155   : > { %v2600_v44 = vpack.c.bf16 %v514_v43, %v508_v39  ;;  %v3358_v43 = vld [vmem:[%s3175_s12 + $0x30] sm:$0xff] }
 0x157   : > { %v3292_v45 = vpop.f32.mrb[4].mxu0  ;;  %2601 = vmatprep.subr.bf16.mxu1 %v2600_v44 }
 0x158   : > { %v520_v48 = vpop.f32.mrb[5].mxu0  ;;  %2603 = vmatpush3.bf16.msra.mxu1 %v2600_v44 }
 0x15b   : > { %v3296_v49 = vpop.f32.mrb[6].mxu0 }
 0x15c   : > { %v526_v52 = vpop.f32.mrb[7].mxu0 }
 0x15d   : > { %v2604_v53 = vpack.c.bf16 %v526_v52, %v520_v48  ;;  %v3368_v48 = vld [vmem:[%s3175_s12 + $0x40] sm:$0xff]  ;;  %v3375_v52 = vld [vmem:[%s3175_s12 + $0x48] sm:$0xff] }
 0x15f   : > { %v3300_v54 = vpop.f32.mrb[8].mxu0  ;;  %2605 = vmatprep.subr.bf16.mxu1 %v2604_v53 }
 0x160   : > { %v532_v57 = vpop.f32.mrb[9].mxu0  ;;  %2607 = vmatpush3.bf16.msra.mxu1 %v2604_v53 }
 0x163   : > { %v3304_v58 = vpop.f32.mrb[10].mxu0 }
 0x164   : > { %v538_v61 = vpop.f32.mrb[11].mxu0 }
 0x165   : > { %v2608_v62 = vpack.c.bf16 %v538_v61, %v532_v57  ;;  %v3385_v57 = vld [vmem:[%s3175_s12 + $0x58] sm:$0xff] }
 0x167   : > { %v3308_v63 = vpop.f32.mrb[12].mxu0  ;;  %2609 = vmatprep.subr.bf16.mxu1 %v2608_v62 }
 0x168   : > { %v544_v3 = vpop.f32.mrb[13].mxu0  ;;  %2611 = vmatpush3.bf16.msra.mxu1 %v2608_v62 }
 0x16b   : > { %v3312_v4 = vpop.f32.mrb[14].mxu0 }
 0x16c   : > { %v550_v6 = vpop.f32.mrb[15].mxu0 }
 0x16d   : > { %v2612_v7 = vpack.c.bf16 %v550_v6, %v544_v3  ;;  %v3398_v3 = vld [vmem:[%s3175_s12 + $0x70] sm:$0xff]  ;;  %v3405_v6 = vld [vmem:[%s3175_s12 + $0x78] sm:$0xff] }
 0x16e   : > { %4208 = vst [vmem:[#allocation12_spill] sm:$0xff] %v3398_v3  ;;  %4209 = vst [vmem:[#allocation13_spill] sm:$0xff] %v3405_v6 }
 0x16f   : > { %v3315_v8 = vpop.f32.mrb[16].mxu0  ;;  %2613 = vmatprep.subr.bf16.mxu1 %v2612_v7 }
 0x170   : > { %v556_v10 = vpop.f32.mrb[17].mxu0  ;;  %2615 = vmatpush3.bf16.msra.mxu1 %v2612_v7 }
 0x173   : > { %v3318_v11 = vpop.f32.mrb[18].mxu0 }
 0x174   : > { %v562_v12 = vpop.f32.mrb[19].mxu0 }
 0x175   : > { %v2616_v13 = vpack.c.bf16 %v562_v12, %v556_v10  ;;  %v3408_v10 = vld [vmem:[%s3175_s12 + $0x80] sm:$0xff] }
 0x176   : > { %4210 = vst [vmem:[#allocation14_spill] sm:$0xff] %v3408_v10 }
 0x177   : > { %v3320_v14 = vpop.f32.mrb[20].mxu0  ;;  %2617 = vmatprep.subr.bf16.mxu1 %v2616_v13 }
 0x178   : > { %v568_v15 = vpop.f32.mrb[21].mxu0  ;;  %2619 = vmatpush3.bf16.msra.mxu1 %v2616_v13 }
 0x17b   : > { %v3322_v16 = vpop.f32.mrb[22].mxu0 }
 0x17c   : > { %v574_v17 = vpop.f32.mrb[23].mxu0 }
 0x17d   : > { %v2620_v18 = vpack.c.bf16 %v574_v17, %v568_v15 }
 0x17f   : > { %v3324_v19 = vpop.f32.mrb[24].mxu0  ;;  %2621 = vmatprep.subr.bf16.mxu1 %v2620_v18 }
 0x180   : > { %v580_v20 = vpop.f32.mrb[25].mxu0  ;;  %2623 = vmatpush3.bf16.msra.mxu1 %v2620_v18 }
 0x183   : > { %v3326_v21 = vpop.f32.mrb[26].mxu0 }
 0x184   : > { %v586_v22 = vpop.f32.mrb[27].mxu0 }
 0x185   : > { %v2624_v23 = vpack.c.bf16 %v586_v22, %v580_v20 }
 0x187   : > { %v3328_v24 = vpop.f32.mrb[28].mxu0  ;;  %2625 = vmatprep.subr.bf16.mxu1 %v2624_v23 }
 0x188   : > { %v592_v25 = vpop.f32.mrb[29].mxu0  ;;  %2627 = vmatpush3.bf16.msra.mxu1 %v2624_v23 }
 0x18b   : > { %v3330_v26 = vpop.f32.mrb[30].mxu0 }
 0x18c   : > { %v598_v27 = vpop.f32.mrb[31].mxu0 }
 0x18d   : > { %v2628_v28 = vpack.c.bf16 %v598_v27, %v592_v25 }
 0x18f   : > { %2629 = vmatprep.subr.bf16.mxu1 %v2628_v28  ;;  %v3332_v29 = vpop.f32.mrb[32].mxu0 }
 0x190   : > { %2631 = vmatpush3.bf16.msra.mxu1 %v2628_v28  ;;  %v604_v31 = vpop.f32.mrb[33].mxu0 }
 0x193   : > { %2377 = vmatmul.mubr.f32.vlgmr.msra.gmra.mrb[0].mxu1 %v3335_v30  ;;  %v3341_v33 = vpop.f32.mrb[34].mxu0 }
 0x194   : > { %2379 = vmatprep.mubr.f32.mxu1 %v3338_v32  ;;  %v610_v35 = vpop.f32.mrb[35].mxu0 }
 0x195   : > { %v2632_v38 = vpack.c.bf16 %v610_v35, %v604_v31 }
 0x197   : > { %2380 = vmatmul.mubr.f32.gmra.mrb[2].mxu1 %v3345_v34  ;;  %v3351_v39 = vpop.f32.mrb[36].mxu0  ;;  %2633 = vmatprep.subr.bf16.mxu1 %v2632_v38 }
 0x198   : > { %2382 = vmatprep.mubr.f32.mxu1 %v3348_v37  ;;  %v616_v42 = vpop.f32.mrb[37].mxu0  ;;  %2635 = vmatpush3.bf16.msra.mxu1 %v2632_v38 }
 0x19b   : > { %2383 = vmatmul.mubr.f32.gmra.mrb[4].mxu1 %v3355_v41  ;;  %v3361_v44 = vpop.f32.mrb[38].mxu0 }
 0x19c   : > { %2385 = vmatprep.mubr.f32.mxu1 %v3358_v43  ;;  %v622_v47 = vpop.f32.mrb[39].mxu0 }
 0x19d   : > { %v2636_v50 = vpack.c.bf16 %v622_v47, %v616_v42 }
 0x19f   : > { %2386 = vmatmul.mubr.f32.gmra.mrb[6].mxu1 %v3365_v46  ;;  %v3371_v51 = vpop.f32.mrb[40].mxu0  ;;  %2637 = vmatprep.subr.bf16.mxu1 %v2636_v50 }
 0x1a0   : > { %2388 = vmatprep.mubr.f32.mxu1 %v3368_v48  ;;  %v628_v53 = vpop.f32.mrb[41].mxu0  ;;  %2639 = vmatpush3.bf16.msra.mxu1 %v2636_v50 }
 0x1a3   : > { %2389 = vmatmul.mubr.f32.gmra.mrb[8].mxu1 %v3375_v52  ;;  %v3381_v56 = vpop.f32.mrb[42].mxu0 }
 0x1a4   : > { %2391 = vmatprep.mubr.f32.mxu1 %v3378_v55  ;;  %v634_v59 = vpop.f32.mrb[43].mxu0 }
 0x1a5   : > { %v2640_v61 = vpack.c.bf16 %v634_v59, %v628_v53  ;;  %v1283_v53 = vld [vmem:[#allocation5 + $0x108] sm:$0xff]  ;;  %v1285_v59 = vld [vmem:[#allocation5 + $0x118] sm:$0xff] }
 0x1a7   : > { %2392 = vmatmul.mubr.f32.gmra.mrb[10].mxu1 %v3385_v57  ;;  %v3391_v62 = vpop.f32.mrb[44].mxu0  ;;  %2641 = vmatprep.subr.bf16.mxu1 %v2640_v61 }
 0x1a8   : > { %2394 = vmatprep.mubr.f32.mxu1 %v3388_v60  ;;  %v640_v2 = vpop.f32.mrb[45].mxu0  ;;  %2643 = vmatpush3.bf16.msra.mxu1 %v2640_v61 }
 0x1ab   : > { %2395 = vmatmul.mubr.f32.gmra.mrb[12].mxu1 %v3395_v1  ;;  %v3401_v5 = vpop.f32.mrb[46].mxu0 }
 0x1ac   : > { %2397 = vmatprep.mubr.f32.mxu1 %v3398_v3  ;;  %v646_v7 = vpop.f32.mrb[47].mxu0 }
 0x1ad   : > { %v2644_v9 = vpack.c.bf16 %v646_v7, %v640_v2 }
 0x1af   : > { %2398 = vmatmul.mubr.f32.gmra.mrb[14].mxu1 %v3405_v6  ;;  %v3411_v12 = vpop.f32.mrb[48].mxu0  ;;  %2645 = vmatprep.subr.bf16.mxu1 %v2644_v9 }
 0x1b0   : > { %v652_v13 = vpop.f32.mrb[49].mxu0  ;;  %2647 = vmatpush3.bf16.msra.mxu1 %v2644_v9  ;;  %2432 = vmatprep.mubr.f32.mxu1 %v3408_v10  ;;  %v2664_v9 = vpack.c.bf16 %v1285_v59, %v1283_v53  ;;  %v1291_v10 = vld [vmem:[#allocation5 + $0x148] sm:$0xff]  ;;  %v3437_v53 = vld [vmem:[%s3175_s12 + $0x98] sm:$0xff] }
 0x1b1   : > { %4213 = vst [vmem:[#allocation17_spill] sm:$0xff] %v3437_v53 }
 0x1b3   : > { %v3414_v15 = vpop.f32.mrb[50].mxu0 }
 0x1b4   : > { %v658_v17 = vpop.f32.mrb[51].mxu0 }
 0x1b5   : > { %v2648_v18 = vpack.c.bf16 %v658_v17, %v652_v13  ;;  %v1282_v13 = vld [vmem:[#allocation5 + $0x100] sm:$0xff]  ;;  %v1284_v17 = vld [vmem:[#allocation5 + $0x110] sm:$0xff] }
 0x1b7   : > { %v3416_v20 = vpop.f32.mrb[52].mxu0  ;;  %2649 = vmatprep.subr.bf16.mxu1 %v2648_v18 }
 0x1b8   : > { %v664_v22 = vpop.f32.mrb[53].mxu0  ;;  %2651 = vmatpush3.bf16.msra.mxu1 %v2648_v18  ;;  %v1287_v18 = vld [vmem:[#allocation5 + $0x128] sm:$0xff] }
 0x1bb   : > { %v3418_v23 = vpop.f32.mrb[54].mxu0 }
 0x1bc   : > { %v670_v25 = vpop.f32.mrb[55].mxu0 }
 0x1bd   : > { %v2652_v27 = vpack.c.bf16 %v670_v25, %v664_v22  ;;  %v1289_v22 = vld [vmem:[#allocation5 + $0x138] sm:$0xff]  ;;  %v3429_v25 = vld [vmem:[%s3175_s12 + $0x88] sm:$0xff] }
 0x1be   : > { %4211 = vst [vmem:[#allocation15_spill] sm:$0xff] %v3429_v25 }
 0x1bf   : > { %v3420_v28 = vpop.f32.mrb[56].mxu0  ;;  %2653 = vmatprep.subr.bf16.mxu1 %v2652_v27 }
 0x1c0   : > { %v676_v31 = vpop.f32.mrb[57].mxu0  ;;  %2655 = vmatpush3.bf16.msra.mxu1 %v2652_v27  ;;  %v2666_v27 = vpack.c.bf16 %v1284_v17, %v1282_v13  ;;  %v1292_v13 = vld [vmem:[#allocation5 + $0x150] sm:$0xff]  ;;  %v1295_v17 = vld [vmem:[#allocation5 + $0x168] sm:$0xff] }
 0x1c3   : > { %v3422_v35 = vpop.f32.mrb[58].mxu0 }
 0x1c4   : > { %v682_v38 = vpop.f32.mrb[59].mxu0 }
 0x1c5   : > { %v2656_v42 = vpack.c.bf16 %v682_v38, %v676_v31  ;;  %v3432_v31 = vld [vmem:[%s3175_s12 + $0x90] sm:$0xff]  ;;  %v2668_v38 = vpack.c.bf16 %v1289_v22, %v1287_v18  ;;  %v1297_v18 = vld [vmem:[#allocation5 + $0x178] sm:$0xff]  ;;  %v3445_v22 = vld [vmem:[%s3175_s12 + $0xa8] sm:$0xff] }
 0x1c6   : > { %4212 = vst [vmem:[#allocation16_spill] sm:$0xff] %v3432_v31  ;;  %4215 = vst [vmem:[#allocation19_spill] sm:$0xff] %v3445_v22 }
 0x1c7   : > { %v3424_v47 = vpop.f32.mrb[60].mxu0  ;;  %2657 = vmatprep.subr.bf16.mxu1 %v2656_v42 }
 0x1c8   : > { %v688_v50 = vpop.f32.mrb[61].mxu0  ;;  %2659 = vmatpush3.bf16.msra.mxu1 %v2656_v42  ;;  %v1286_v42 = vld [vmem:[#allocation5 + $0x120] sm:$0xff] }
 0x1c9   : > { %v2670_v59 = vpack.c.bf16 %v1288_v0, %v1286_v42  ;;  %v2676_v0 = vpack.c.bf16 %v1297_v18, %v1295_v17  ;;  %v1299_v42 = vld [vmem:[#allocation5 + $0x188] sm:$0xff]  ;;  %v1305_v18 = vld [vmem:[#allocation5 + $0x1b8] sm:$0xff] }
 0x1ca   : > { %v1303_v17 = vld [vmem:[#allocation5 + $0x1a8] sm:$0xff] }
 0x1cb   : > { %v3426_v61 = vpop.f32.mrb[62].mxu0 }
 0x1cc   : > { %v694_v2 = vpop.f32.mrb[63].mxu0 }
 0x1cd   : > { %v2660_v7 = vpack.c.bf16 %v694_v2, %v688_v50  ;;  %v1293_v50 = vld [vmem:[#allocation5 + $0x158] sm:$0xff]  ;;  %v3440_v2 = vld [vmem:[%s3175_s12 + $0xa0] sm:$0xff] }
 0x1ce   : > { %4214 = vst [vmem:[#allocation18_spill] sm:$0xff] %v3440_v2 }
 0x1cf   : > { %2661 = vmatprep.subr.bf16.mxu1 %v2660_v7 }
 0x1d0   : > { %2663 = vmatpush3.bf16.msra.mxu1 %v2660_v7  ;;  %v2672_v7 = vpack.c.bf16 %v1293_v50, %v1291_v10  ;;  %v1296_v10 = vld [vmem:[#allocation5 + $0x170] sm:$0xff]  ;;  %v1301_v50 = vld [vmem:[#allocation5 + $0x198] sm:$0xff] }
 0x1d1   : > { %2665 = vmatprep.subr.bf16.mxu1 %v2664_v9  ;;  %v1290_v9 = vld [vmem:[#allocation5 + $0x140] sm:$0xff] }
 0x1d3   : > { %2433 = vmatmul.mubr.f32.vlgmr.msra.gmra.mrb[16].mxu1 %v3429_v25  ;;  %v3480_v25 = vld [vmem:[%s3175_s12 + $0xf0] sm:$0xff] }
 0x1d4   : > { %2435 = vmatprep.mubr.f32.mxu1 %v3432_v31  ;;  %2667 = vmatpush1.bf16.msra.mxu1 %v2666_v27  ;;  %v2674_v31 = vpack.c.bf16 %v1292_v13, %v1290_v9  ;;  %v3448_v27 = vld [vmem:[%s3175_s12 + $0xb0] sm:$0xff]  ;;  %v2680_v9 = vpack.c.bf16 %v1301_v50, %v1299_v42  ;;  %v1307_v42 = vld [vmem:[#allocation5 + $0x1c8] sm:$0xff]  ;;  %v1309_v50 = vld [vmem:[#allocation5 + $0x1d8] sm:$0xff]  ;;  %4224 = vst [vmem:[#allocation28_spill] sm:$0xff] %v3480_v25 }
 0x1d5   : > { %2669 = vmatprep.subr.bf16.mxu1 %v2668_v38  ;;  %4216 = vst [vmem:[#allocation20_spill] sm:$0xff] %v3448_v27  ;;  %v1294_v38 = vld [vmem:[#allocation5 + $0x160] sm:$0xff]  ;;  %v1300_v13 = vld [vmem:[#allocation5 + $0x190] sm:$0xff] }
 0x1d7   : > { %2436 = vmatmul.mubr.f32.gmra.mrb[18].mxu1 %v3437_v53  ;;  %v2678_v53 = vpack.c.bf16 %v1296_v10, %v1294_v38  ;;  %v2684_v38 = vpack.c.bf16 %v1305_v18, %v1303_v17  ;;  %v1304_v10 = vld [vmem:[#allocation5 + $0x1b0] sm:$0xff]  ;;  %v1311_v17 = vld [vmem:[#allocation5 + $0x1e8] sm:$0xff]  ;;  %v1313_v18 = vld [vmem:[#allocation5 + $0x1f8] sm:$0xff] }
 0x1d8   : > { %2438 = vmatprep.mubr.f32.mxu1 %v3440_v2  ;;  %2671 = vmatpush1.bf16.msra.mxu1 %v2670_v59  ;;  %v3453_v2 = vld [vmem:[%s3175_s12 + $0xb8] sm:$0xff]  ;;  %v3456_v59 = vld [vmem:[%s3175_s12 + $0xc0] sm:$0xff] }
 0x1d9   : > { %2673 = vmatprep.subr.bf16.mxu1 %v2672_v7  ;;  %4217 = vst [vmem:[#allocation21_spill] sm:$0xff] %v3453_v2  ;;  %4218 = vst [vmem:[#allocation22_spill] sm:$0xff] %v3456_v59  ;;  %v1298_v7 = vld [vmem:[#allocation5 + $0x180] sm:$0xff] }
 0x1db   : > { %2439 = vmatmul.mubr.f32.gmra.mrb[20].mxu1 %v3445_v22  ;;  %v2682_v22 = vpack.c.bf16 %v1300_v13, %v1298_v7  ;;  %v2688_v7 = vpack.c.bf16 %v1309_v50, %v1307_v42  ;;  %v1308_v13 = vld [vmem:[#allocation5 + $0x1d0] sm:$0xff]  ;;  %v3489_v50 = vpop.permute.xlu1 %999 }
 0x1dc   : > { %2441 = vmatprep.mubr.f32.mxu1 %v3448_v27  ;;  %2675 = vmatpush1.bf16.msra.mxu1 %v2674_v31  ;;  %v3461_v27 = vld [vmem:[%s3175_s12 + $0xc8] sm:$0xff]  ;;  %v3464_v31 = vld [vmem:[%s3175_s12 + $0xd0] sm:$0xff] }
 0x1dd   : > { %2677 = vmatprep.subr.bf16.mxu1 %v2676_v0  ;;  %4219 = vst [vmem:[#allocation23_spill] sm:$0xff] %v3461_v27  ;;  %4220 = vst [vmem:[#allocation24_spill] sm:$0xff] %v3464_v31  ;;  %v1302_v0 = vld [vmem:[#allocation5 + $0x1a0] sm:$0xff] }
 0x1df   : > { %2442 = vmatmul.mubr.f32.gmra.mrb[22].mxu1 %v3453_v2  ;;  %v2686_v2 = vpack.c.bf16 %v1304_v10, %v1302_v0  ;;  %v1310_v0 = vld [vmem:[#allocation5 + $0x1e0] sm:$0xff]  ;;  %v3485_v10 = vld [vmem:[%s3175_s12 + $0xf8] sm:$0xff] }
 0x1e0   : > { %2444 = vmatprep.mubr.f32.mxu1 %v3456_v59  ;;  %2679 = vmatpush1.bf16.msra.mxu1 %v2678_v53  ;;  %v3469_v59 = vld [vmem:[%s3175_s12 + $0xd8] sm:$0xff]  ;;  %v3472_v53 = vld [vmem:[%s3175_s12 + $0xe0] sm:$0xff]  ;;  %4225 = vst [vmem:[#allocation29_spill] sm:$0xff] %v3485_v10 }
 0x1e1   : > { %2681 = vmatprep.subr.bf16.mxu1 %v2680_v9  ;;  %4221 = vst [vmem:[#allocation25_spill] sm:$0xff] %v3469_v59  ;;  %4222 = vst [vmem:[#allocation26_spill] sm:$0xff] %v3472_v53  ;;  %v1306_v9 = vld [vmem:[#allocation5 + $0x1c0] sm:$0xff] }
 0x1e3   : > { %2445 = vmatmul.mubr.f32.gmra.mrb[24].mxu1 %v3461_v27  ;;  %v3477_v27 = vld [vmem:[%s3175_s12 + $0xe8] sm:$0xff]  ;;  %s2076_s12 = sshll.u32 %s3903_s11, 4  ;;  %s4082_s12 = int_to_ptr.vmem [resolvable:$true] %s2076_s12 }
 0x1e4   : > { %2447 = vmatprep.mubr.f32.mxu1 %v3464_v31  ;;  %2683 = vmatpush1.bf16.msra.mxu1 %v2682_v22  ;;  %4223 = vst [vmem:[#allocation27_spill] sm:$0xff] %v3477_v27  ;;  %v2690_v31 = vpack.c.bf16 %v1308_v13, %v1306_v9  ;;  %v2692_v22 = vpack.c.bf16 %v1313_v18, %v1311_v17  ;;  %v3493_v9 = vpop.permute.xlu1 %1004  ;;  %s2917_s6 = scalar_lea.vmem %s4082_s12, 4096 }
 0x1e5   : > { %2685 = vmatprep.subr.bf16.mxu1 %v2684_v38  ;;  %v1312_v38 = vld [vmem:[#allocation5 + $0x1f0] sm:$0xff]  ;;  %4227 = vst [vmem:[#allocation30_spill] sm:$0xff] %v3493_v9  ;;  %p2918_p6 = scmp.ne.s32.totalorder %s4082_s12, %s2917_s6 }
 0x1e6   : > { %v2694_v42 = vpack.c.bf16 %v1312_v38, %v1310_v0 }
 0x1e7   : > { %2448 = vmatmul.mubr.f32.gmra.mrb[26].mxu1 %v3469_v59  ;;  %p2919_p8 = pnand %p2918_p6, %p3121_p12 }
 0x1e8   : > { %2450 = vmatprep.mubr.f32.mxu1 %v3472_v53  ;;  %2687 = vmatpush1.bf16.msra.mxu1 %v2686_v2  ;;  %v4226_v2 = vmov 0.0   ;;  %v3497_v17 = vpop.permute.xlu1 %1014 }
 0x1e9   : > { %2689 = vmatprep.subr.bf16.mxu1 %v2688_v7  ;;  %v3491_v7 = vpop.permute.xlu0 %989  ;;  %p2920_p10 = pneg %p2919_p8 }
 0x1eb   : > { %2451 = vmatmul.mubr.f32.gmra.mrb[28].mxu1 %v3477_v27 }
 0x1ec   : > { %2453 = vmatprep.mubr.f32.mxu1 %v3480_v25  ;;  %2691 = vmatpush1.bf16.msra.mxu1 %v2690_v31  ;;  %v3502_v31 = vld [vmem:[%s4132_s4] ss:$0 sm:$0xff]  ;;  %v3514_v53 = vpop.permute.xlu1 %1024 }
 0x1ed   : > { %2693 = vmatprep.subr.bf16.mxu1 %v2692_v22  ;;  %v3495_v13 = vpop.permute.xlu0 %994  ;;  %v1186_v0 = vadd.f32 %v3502_v31, %v3288_v40  ;;  %4229 = vst [vmem:[#allocation32_spill] sm:$0xff] %v3514_v53  ;;  %v1188_v3 = vadd.f32 %v3502_v31, %v3296_v49  ;;  %v1190_v49 = vadd.f32 %v3502_v31, %v3304_v58 }
 0x1ef   : > { %2454 = vmatmul.mubr.f32.gmra.mrb[30].mxu1 %v3485_v10  ;;  %v1185_v10 = vadd.f32 %v3502_v31, %v3284_v36  ;;  %v1187_v36 = vadd.f32 %v3502_v31, %v3292_v45  ;;  %v1189_v45 = vadd.f32 %v3502_v31, %v3300_v54 }
 0x1f0   : > { %2695 = vmatpush1.bf16.msra.mxu1 %v2694_v42  ;;  %1380 = vmatprep.mubr.f32.mxu1 %v4226_v2 }
 0x1f1   : > { %v3504_v18 = vpop.permute.xlu0 %1009 }
 0x1f2   : > { %4228 = vst [vmem:[#allocation31_spill] sm:$0xff] %v3504_v18 }
 0x1f5   : > { %v3520_v1 = vpop.permute.xlu0 %1019 }
 0x1f6   : > { %4230 = vst [vmem:[#allocation33_spill] sm:$0xff] %v3520_v1 }
 0x266   : > { %v2378_v22 = vpop.f32.mrb[0].mxu1 }
 0x267   : > { %v1148_v38 = vmul.f32 %v2378_v22, %v3495_v13  ;;  %v763_v42 = vpop.f32.mrb[1].mxu1 }
 0x268   : > { %v1147_v25 = vmul.f32 %v3491_v7, %v763_v42 }
 0x269   : > { %v3512_v27 = vadd.f32 %v1186_v0, %v1148_v38 }
 0x26a   : > { %v3516_v59 = vadd.f32 %v1185_v10, %v1147_v25  ;;  %v2381_v6 = vpop.f32.mrb[2].mxu1 }
 0x26b   : > { %v1150_v40 = vmul.f32 %v2381_v6, %v3493_v9  ;;  %v773_v22 = vpop.f32.mrb[3].mxu1  ;;  %v3537_v9 = vpop.permute.xlu1 %1034 }
 0x26c   : > { %v1149_v42 = vmul.f32 %v3489_v50, %v773_v22  ;;  %1381 = vmatmul.mubr.f32.vlgmr.msra.gmra.mrb[32].mxu1 %v3516_v59  ;;  %4231 = vst [vmem:[#allocation34_spill] sm:$0xff] %v3537_v9 }
 0x26d   : > { %v3527_v0 = vadd.f32 %v1188_v3, %v1150_v40  ;;  %1386 = vmatprep.mubr.f32.mxu1 %v4226_v2  ;;  %v3541_v3 = vpop.permute.xlu0 %1029 }
 0x26e   : > { %v3530_v25 = vadd.f32 %v1187_v36, %v1149_v42  ;;  %v2384_v10 = vpop.f32.mrb[4].mxu1  ;;  %v1192_v42 = vadd.f32 %v3502_v31, %v3312_v4  ;;  %v1194_v4 = vadd.f32 %v3502_v31, %v3318_v11  ;;  %v1196_v11 = vadd.f32 %v3502_v31, %v3322_v16 }
 0x26f   : > { %v1152_v6 = vmul.f32 %v2384_v10, %v3497_v17  ;;  %v783_v38 = vpop.f32.mrb[5].mxu1 }
 0x270   : > { %v1151_v22 = vmul.f32 %v3504_v18, %v783_v38  ;;  %1387 = vmatmul.mubr.f32.gmra.mrb[34].mxu1 %v3512_v27  ;;  %v1191_v38 = vadd.f32 %v3502_v31, %v3308_v63 }
 0x271   : > { %v3543_v40 = vadd.f32 %v1190_v49, %v1152_v6  ;;  %1392 = vmatprep.mubr.f32.mxu1 %v4226_v2  ;;  %v3558_v6 = vpop.permute.xlu1 %1044 }
 0x272   : > { %v3546_v36 = vadd.f32 %v1189_v45, %v1151_v22  ;;  %v2387_v58 = vpop.f32.mrb[6].mxu1 }
 0x273   : > { %v1154_v54 = vmul.f32 %v2387_v58, %v3514_v53  ;;  %v793_v10 = vpop.f32.mrb[7].mxu1  ;;  %v3564_v58 = vpop.permute.xlu0 %1039 }
 0x274   : > { %v1153_v18 = vmul.f32 %v3520_v1, %v793_v10  ;;  %1393 = vmatmul.mubr.f32.gmra.mrb[36].mxu1 %v3530_v25  ;;  %4232 = vst [vmem:[#allocation35_spill] sm:$0xff] %v3564_v58  ;;  %v1193_v10 = vadd.f32 %v3502_v31, %v3315_v8  ;;  %v1195_v8 = vadd.f32 %v3502_v31, %v3320_v14 }
 0x275   : > { %v3555_v49 = vadd.f32 %v1192_v42, %v1154_v54  ;;  %1398 = vmatprep.mubr.f32.mxu1 %v4226_v2  ;;  %v3581_v1 = vpop.permute.xlu1 %1054 }
 0x276   : > { %v3560_v45 = vadd.f32 %v1191_v38, %v1153_v18  ;;  %v2390_v22 = vpop.f32.mrb[8].mxu1  ;;  %4233 = vst [vmem:[#allocation36_spill] sm:$0xff] %v3581_v1 }
 0x277   : > { %v1156_v63 = vmul.f32 %v2390_v22, %v3537_v9  ;;  %v803_v53 = vpop.f32.mrb[9].mxu1 }
 0x278   : > { %v1155_v42 = vmul.f32 %v3541_v3, %v803_v53  ;;  %1399 = vmatmul.mubr.f32.gmra.mrb[38].mxu1 %v3527_v0 }
 0x279   : > { %v3571_v54 = vadd.f32 %v1194_v4, %v1156_v63  ;;  %1404 = vmatprep.mubr.f32.mxu1 %v4226_v2  ;;  %v3585_v4 = vpop.permute.xlu0 %1049 }
 0x27a   : > { %v3574_v18 = vadd.f32 %v1193_v10, %v1155_v42  ;;  %v2393_v38 = vpop.f32.mrb[10].mxu1  ;;  %4234 = vst [vmem:[#allocation37_spill] sm:$0xff] %v3585_v4  ;;  %v1198_v42 = vadd.f32 %v3502_v31, %v3326_v21  ;;  %v1200_v21 = vadd.f32 %v3502_v31, %v3330_v26 }
 0x27b   : > { %v1158_v22 = vmul.f32 %v2393_v38, %v3558_v6  ;;  %v813_v9 = vpop.f32.mrb[11].mxu1 }
 0x27c   : > { %v1157_v53 = vmul.f32 %v3564_v58, %v813_v9  ;;  %1405 = vmatmul.mubr.f32.gmra.mrb[40].mxu1 %v3546_v36  ;;  %v1197_v9 = vadd.f32 %v3502_v31, %v3324_v19 }
 0x27d   : > { %v3587_v63 = vadd.f32 %v1196_v11, %v1158_v22  ;;  %1410 = vmatprep.mubr.f32.mxu1 %v4226_v2  ;;  %v3602_v22 = vpop.permute.xlu1 %1064 }
 0x27e   : > { %v3590_v10 = vadd.f32 %v1195_v8, %v1157_v53  ;;  %v2396_v16 = vpop.f32.mrb[12].mxu1  ;;  %4237 = vst [vmem:[#allocation40_spill] sm:$0xff] %v3602_v22 }
 0x27f   : > { %v1160_v14 = vmul.f32 %v2396_v16, %v3581_v1  ;;  %v823_v38 = vpop.f32.mrb[13].mxu1  ;;  %v3608_v16 = vpop.permute.xlu0 %1059 }
 0x280   : > { %4235 = vst [vmem:[#allocation38_spill] sm:$0xff] %v3590_v10  ;;  %v1159_v58 = vmul.f32 %v3585_v4, %v823_v38  ;;  %1411 = vmatmul.mubr.f32.gmra.mrb[42].mxu1 %v3543_v40  ;;  %4239 = vst [vmem:[#allocation42_spill] sm:$0xff] %v3608_v16  ;;  %v1199_v38 = vadd.f32 %v3502_v31, %v3328_v24 }
 0x281   : > { %v3599_v11 = vadd.f32 %v1198_v42, %v1160_v14  ;;  %1416 = vmatprep.mubr.f32.mxu1 %v4226_v2  ;;  %v3628_v24 = vpop.permute.xlu1 %1074 }
 0x282   : > { %v3604_v8 = vadd.f32 %v1197_v9, %v1159_v58  ;;  %v2399_v53 = vpop.f32.mrb[14].mxu1  ;;  %4241 = vst [vmem:[#allocation44_spill] sm:$0xff] %v3628_v24 }
 0x283   : > { %4236 = vst [vmem:[#allocation39_spill] sm:$0xff] %v3599_v11  ;;  %v1162_v19 = vmul.f32 %v2399_v53, %v3602_v22  ;;  %v833_v1 = vpop.f32.mrb[15].mxu1  ;;  %v3631_v26 = vpop.permute.xlu0 %1069 }
 0x284   : > { %4238 = vst [vmem:[#allocation41_spill] sm:$0xff] %v3604_v8  ;;  %v1161_v42 = vmul.f32 %v3608_v16, %v833_v1  ;;  %1417 = vmatmul.mubr.f32.gmra.mrb[44].mxu1 %v3560_v45  ;;  %4242 = vst [vmem:[#allocation45_spill] sm:$0xff] %v3631_v26 }
 0x285   : > { %v3615_v14 = vadd.f32 %v1200_v21, %v1162_v19  ;;  %1422 = vmatprep.mubr.f32.mxu1 %v4226_v2  ;;  %v3636_v1 = vpop.permute.xlu1 %1084 }
 0x286   : > { %v3618_v58 = vadd.f32 %v1199_v38, %v1161_v42  ;;  %4243 = vst [vmem:[#allocation46_spill] sm:$0xff] %v3636_v1  ;;  %v1202_v38 = vadd.f32 %v3502_v31, %v3341_v33  ;;  %v1204_v33 = vadd.f32 %v3502_v31, %v3361_v44  ;;  %v1206_v44 = vadd.f32 %v3502_v31, %v3381_v56 }
 0x287   : > { %v3638_v9 = vpop.permute.xlu0 %1079 }
 0x288   : > { %4240 = vst [vmem:[#allocation43_spill] sm:$0xff] %v3618_v58  ;;  %1423 = vmatmul.mubr.f32.gmra.mrb[46].mxu1 %v3555_v49 }
 0x289   : > { %1428 = vmatprep.mubr.f32.mxu1 %v4226_v2  ;;  %v3642_v53 = vpop.permute.xlu1 %1094 }
 0x28b   : > { %v3645_v21 = vpop.permute.xlu0 %1089 }
 0x28c   : > { %1429 = vmatmul.mubr.f32.gmra.mrb[48].mxu1 %v3574_v18  ;;  %4244 = vst [vmem:[#allocation47_spill] sm:$0xff] %v3645_v21 }
 0x28d   : > { %1434 = vmatprep.mubr.f32.mxu1 %v4226_v2 }
 0x290   : > { %1435 = vmatmul.mubr.f32.gmra.mrb[50].mxu1 %v3571_v54 }
 0x291   : > { %1440 = vmatprep.mubr.f32.mxu1 %v4226_v2 }
 0x294   : > { %1441 = vmatmul.mubr.f32.gmra.mrb[52].mxu1 %v3590_v10 }
 0x295   : > { %1446 = vmatprep.mubr.f32.mxu1 %v4226_v2 }
 0x298   : > { %1447 = vmatmul.mubr.f32.gmra.mrb[54].mxu1 %v3587_v63 }
 0x299   : > { %1452 = vmatprep.mubr.f32.mxu1 %v4226_v2 }
 0x29c   : > { %1453 = vmatmul.mubr.f32.gmra.mrb[56].mxu1 %v3604_v8  ;;  %v1201_v8 = vadd.f32 %v3502_v31, %v3332_v29 }
 0x29d   : > { %1458 = vmatprep.mubr.f32.mxu1 %v4226_v2 }
 0x2a0   : > { %1459 = vmatmul.mubr.f32.gmra.mrb[58].mxu1 %v3599_v11 }
 0x2a1   : > { %1464 = vmatprep.mubr.f32.mxu1 %v4226_v2 }
 0x2a4   : > { %1465 = vmatmul.mubr.f32.gmra.mrb[60].mxu1 %v3618_v58  ;;  %v3658_v58 = vpop.permute.xlu1 %1104 }
 0x2a5   : > { %1470 = vmatprep.mubr.f32.mxu1 %v4226_v2  ;;  %4245 = vst [vmem:[#allocation48_spill] sm:$0xff] %v3658_v58 }
 0x2a6   : > { %v2434_v19 = vpop.f32.mrb[16].mxu1 }
 0x2a7   : > { %v1164_v42 = vmul.f32 %v2434_v19, %v3628_v24  ;;  %v908_v16 = vpop.f32.mrb[17].mxu1  ;;  %v3664_v19 = vpop.permute.xlu0 %1099 }
 0x2a8   : > { %v1163_v22 = vmul.f32 %v3631_v26, %v908_v16  ;;  %1471 = vmatmul.mubr.f32.gmra.mrb[62].mxu1 %v3615_v14  ;;  %4246 = vst [vmem:[#allocation49_spill] sm:$0xff] %v3664_v19  ;;  %v1203_v16 = vadd.f32 %v3502_v31, %v3351_v39  ;;  %v1205_v39 = vadd.f32 %v3502_v31, %v3371_v51  ;;  %v3681_v26 = vpop.permute.xlu1 %1114 }
 0x2a9   : > { %v3655_v11 = vadd.f32 %v1202_v38, %v1164_v42  ;;  %1476 = vmatprep.mubr.f32.mxu1 %v4226_v2  ;;  %4247 = vst [vmem:[#allocation50_spill] sm:$0xff] %v3681_v26 }
 0x2aa   : > { %v3660_v4 = vadd.f32 %v1201_v8, %v1163_v22  ;;  %v2437_v10 = vpop.f32.mrb[18].mxu1 }
 0x2ab   : > { %v1166_v29 = vmul.f32 %v2437_v10, %v3636_v1  ;;  %v918_v24 = vpop.f32.mrb[19].mxu1 }
 0x2ac   : > { %v1165_v38 = vmul.f32 %v3638_v9, %v918_v24  ;;  %1477 = vmatmul.mubr.f32.gmra.mrb[64].mxu1 %v3660_v4 }
 0x2ad   : > { %v3671_v42 = vadd.f32 %v1204_v33, %v1166_v29  ;;  %1482 = vmatprep.mubr.f32.mxu1 %v4226_v2  ;;  %v3685_v33 = vpop.permute.xlu0 %1109 }
 0x2ae   : > { %v3674_v22 = vadd.f32 %v1203_v16, %v1165_v38  ;;  %v2440_v8 = vpop.f32.mrb[20].mxu1  ;;  %4248 = vst [vmem:[#allocation51_spill] sm:$0xff] %v3685_v33  ;;  %v1208_v38 = vadd.f32 %v3502_v31, %v3401_v5  ;;  %v1210_v5 = vadd.f32 %v3502_v31, %v3414_v15  ;;  %v1212_v15 = vadd.f32 %v3502_v31, %v3418_v23 }
 0x2af   : > { %v1168_v10 = vmul.f32 %v2440_v8, %v3642_v53  ;;  %v928_v1 = vpop.f32.mrb[21].mxu1 }
 0x2b0   : > { %v1167_v24 = vmul.f32 %v3645_v21, %v928_v1  ;;  %1483 = vmatmul.mubr.f32.gmra.mrb[66].mxu1 %v3655_v11  ;;  %v1207_v1 = vadd.f32 %v3502_v31, %v3391_v62 }
 0x2b1   : > { %v3687_v29 = vadd.f32 %v1206_v44, %v1168_v10  ;;  %1488 = vmatprep.mubr.f32.mxu1 %v4226_v2  ;;  %v3702_v10 = vpop.permute.xlu1 %1124 }
 0x2b2   : > { %v3690_v16 = vadd.f32 %v1205_v39, %v1167_v24  ;;  %v2443_v56 = vpop.f32.mrb[22].mxu1  ;;  %4250 = vst [vmem:[#allocation53_spill] sm:$0xff] %v3702_v10 }
 0x2b3   : > { %v1170_v51 = vmul.f32 %v2443_v56, %v3658_v58  ;;  %v938_v8 = vpop.f32.mrb[23].mxu1  ;;  %v3708_v56 = vpop.permute.xlu0 %1119 }
 0x2b4   : > { %v1169_v21 = vmul.f32 %v3664_v19, %v938_v8  ;;  %1489 = vmatmul.mubr.f32.gmra.mrb[68].mxu1 %v3674_v22  ;;  %4252 = vst [vmem:[#allocation55_spill] sm:$0xff] %v3708_v56  ;;  %v1209_v8 = vadd.f32 %v3502_v31, %v3411_v12  ;;  %v1211_v12 = vadd.f32 %v3502_v31, %v3416_v20 }
 0x2b5   : > { %v3699_v44 = vadd.f32 %v1208_v38, %v1170_v51  ;;  %1494 = vmatprep.mubr.f32.mxu1 %v4226_v2  ;;  %v3725_v19 = vpop.permute.xlu1 %1134 }
 0x2b6   : > { %v3704_v39 = vadd.f32 %v1207_v1, %v1169_v21  ;;  %v2446_v24 = vpop.f32.mrb[24].mxu1  ;;  %4255 = vst [vmem:[#allocation58_spill] sm:$0xff] %v3725_v19 }
 0x2b7   : > { %4249 = vst [vmem:[#allocation52_spill] sm:$0xff] %v3699_v44  ;;  %v1172_v62 = vmul.f32 %v2446_v24, %v3681_v26  ;;  %v948_v58 = vpop.f32.mrb[25].mxu1 }
 0x2b8   : > { %4251 = vst [vmem:[#allocation54_spill] sm:$0xff] %v3704_v39  ;;  %v1171_v38 = vmul.f32 %v3685_v33, %v948_v58  ;;  %1495 = vmatmul.mubr.f32.gmra.mrb[70].mxu1 %v3671_v42 }
 0x2b9   : > { %v3715_v51 = vadd.f32 %v1210_v5, %v1172_v62  ;;  %1500 = vmatprep.mubr.f32.mxu1 %v4226_v2  ;;  %v3729_v5 = vpop.permute.xlu0 %1129 }
 0x2ba   : > { %v3718_v21 = vadd.f32 %v1209_v8, %v1171_v38  ;;  %v2449_v1 = vpop.f32.mrb[26].mxu1  ;;  %4256 = vst [vmem:[#allocation59_spill] sm:$0xff] %v3729_v5  ;;  %v1214_v38 = vadd.f32 %v3502_v31, %v3422_v35  ;;  %v1216_v35 = vadd.f32 %v3502_v31, %v3426_v61 }
 0x2bb   : > { %4253 = vst [vmem:[#allocation56_spill] sm:$0xff] %v3715_v51  ;;  %v1174_v24 = vmul.f32 %v2449_v1, %v3702_v10  ;;  %v958_v26 = vpop.f32.mrb[27].mxu1 }
 0x2bc   : > { %4254 = vst [vmem:[#allocation57_spill] sm:$0xff] %v3718_v21  ;;  %v1173_v58 = vmul.f32 %v3708_v56, %v958_v26  ;;  %1501 = vmatmul.mubr.f32.gmra.mrb[72].mxu1 %v3690_v16  ;;  %v1213_v26 = vadd.f32 %v3502_v31, %v3420_v28 }
 0x2bd   : > { %v3731_v62 = vadd.f32 %v1212_v15, %v1174_v24  ;;  %1506 = vmatprep.mubr.f32.mxu1 %v4226_v2  ;;  %v3746_v24 = vpop.permute.xlu1 %1144 }
 0x2be   : > { %v3734_v8 = vadd.f32 %v1211_v12, %v1173_v58  ;;  %v2452_v23 = vpop.f32.mrb[28].mxu1  ;;  %4260 = vst [vmem:[#allocation63_spill] sm:$0xff] %v3746_v24 }
 0x2bf   : > { %4257 = vst [vmem:[#allocation60_spill] sm:$0xff] %v3731_v62  ;;  %v1176_v20 = vmul.f32 %v2452_v23, %v3725_v19  ;;  %v968_v1 = vpop.f32.mrb[29].mxu1  ;;  %v3752_v23 = vpop.permute.xlu0 %1139 }
 0x2c0   : > { %4258 = vst [vmem:[#allocation61_spill] sm:$0xff] %v3734_v8  ;;  %v1175_v56 = vmul.f32 %v3729_v5, %v968_v1  ;;  %1507 = vmatmul.mubr.f32.gmra.mrb[74].mxu1 %v3687_v29  ;;  %4262 = vst [vmem:[#allocation65_spill] sm:$0xff] %v3752_v23  ;;  %v1215_v1 = vadd.f32 %v3502_v31, %v3424_v47 }
 0x2c1   : > { %v3743_v15 = vadd.f32 %v1214_v38, %v1176_v20  ;;  %1512 = vmatprep.mubr.f32.mxu1 %v4226_v2 }
 0x2c2   : > { %v3748_v12 = vadd.f32 %v1213_v26, %v1175_v56  ;;  %v2455_v58 = vpop.f32.mrb[30].mxu1 }
 0x2c3   : > { %4259 = vst [vmem:[#allocation62_spill] sm:$0xff] %v3743_v15  ;;  %v1178_v28 = vmul.f32 %v2455_v58, %v3746_v24  ;;  %v978_v19 = vpop.f32.mrb[31].mxu1 }
 0x2c4   : > { %4261 = vst [vmem:[#allocation64_spill] sm:$0xff] %v3748_v12  ;;  %v1177_v38 = vmul.f32 %v3752_v23, %v978_v19  ;;  %1513 = vmatmul.mubr.f32.gmra.mrb[76].mxu1 %v3704_v39 }
 0x2c5   : > { %v3759_v20 = vadd.f32 %v1216_v35, %v1178_v28  ;;  %1518 = vmatprep.mubr.f32.mxu1 %v4226_v2 }
 0x2c6   : > { %v3762_v56 = vadd.f32 %v1215_v1, %v1177_v38 }
 0x2c7   : > { %4263 = vst [vmem:[#allocation66_spill] sm:$0xff] %v3759_v20 }
 0x2c8   : > { %4264 = vst [vmem:[#allocation67_spill] sm:$0xff] %v3762_v56  ;;  %1519 = vmatmul.mubr.f32.gmra.mrb[78].mxu1 %v3699_v44 }
 0x2c9   : > { %1524 = vmatprep.mubr.f32.mxu1 %v4226_v2 }
 0x2cc   : > { %1525 = vmatmul.mubr.f32.gmra.mrb[80].mxu1 %v3718_v21 }
 0x2cd   : > { %1530 = vmatprep.mubr.f32.mxu1 %v4226_v2 }
 0x2d0   : > { %1531 = vmatmul.mubr.f32.gmra.mrb[82].mxu1 %v3715_v51 }
 0x2d1   : > { %1536 = vmatprep.mubr.f32.mxu1 %v4226_v2 }
 0x2d4   : > { %1537 = vmatmul.mubr.f32.gmra.mrb[84].mxu1 %v3734_v8 }
 0x2d5   : > { %1542 = vmatprep.mubr.f32.mxu1 %v4226_v2 }
 0x2d8   : > { %1543 = vmatmul.mubr.f32.gmra.mrb[86].mxu1 %v3731_v62 }
 0x2d9   : > { %1548 = vmatprep.mubr.f32.mxu1 %v4226_v2 }
 0x2dc   : > { %1549 = vmatmul.mubr.f32.gmra.mrb[88].mxu1 %v3748_v12 }
 0x2dd   : > { %1554 = vmatprep.mubr.f32.mxu1 %v4226_v2 }
 0x2e0   : > { %1555 = vmatmul.mubr.f32.gmra.mrb[90].mxu1 %v3743_v15 }
 0x2e1   : > { %1560 = vmatprep.mubr.f32.mxu1 %v4226_v2 }
 0x2e4   : > { %1561 = vmatmul.mubr.f32.gmra.mrb[92].mxu1 %v3762_v56 }
 0x2e5   : > { %1566 = vmatprep.mubr.f32.mxu1 %v4226_v2 }
 0x2e8   : > { %1567 = vmatmul.mubr.f32.gmra.mrb[94].mxu1 %v3759_v20 }
 0x33f   : > { %v3781_v47 = vpop.f32.mrb[32].mxu1 }
 0x340   : > { %v1384_v61 = vpop.f32.mrb[33].mxu1 }
 0x343   : > { %v3783_v31 = vpop.f32.mrb[34].mxu1 }
 0x344   : > { %v1390_v19 = vpop.f32.mrb[35].mxu1 }
 0x345   : > { %v2696_v26 = vpack.c.bf16 %v1390_v19, %v1384_v61 }
 0x347   : > { %v3785_v58 = vpop.f32.mrb[36].mxu1  ;;  %2697 = vmatprep.subr.bf16.mxu0 %v2696_v26 }
 0x348   : > { %v1396_v35 = vpop.f32.mrb[37].mxu1  ;;  %2699 = vmatpush3.bf16.msra.mxu0 %v2696_v26 }
 0x34b   : > { %v3787_v28 = vpop.f32.mrb[38].mxu1 }
 0x34c   : > { %v1402_v1 = vpop.f32.mrb[39].mxu1 }
 0x34d   : > { %v2700_v38 = vpack.c.bf16 %v1402_v1, %v1396_v35 }
 0x34f   : > { %v3789_v56 = vpop.f32.mrb[40].mxu1  ;;  %2701 = vmatprep.subr.bf16.mxu0 %v2700_v38 }
 0x350   : > { %v1408_v2 = vpop.f32.mrb[41].mxu1  ;;  %2703 = vmatpush3.bf16.msra.mxu0 %v2700_v38 }
 0x353   : > { %v3791_v20 = vpop.f32.mrb[42].mxu1 }
 0x354   : > { %v1414_v23 = vpop.f32.mrb[43].mxu1 }
 0x355   : > { %v2704_v12 = vpack.c.bf16 %v1414_v23, %v1408_v2 }
 0x357   : > { %v3793_v24 = vpop.f32.mrb[44].mxu1  ;;  %2705 = vmatprep.subr.bf16.mxu0 %v2704_v12 }
 0x358   : > { %v1420_v61 = vpop.f32.mrb[45].mxu1  ;;  %2707 = vmatpush3.bf16.msra.mxu0 %v2704_v12 }
 0x35b   : > { %v3795_v19 = vpop.f32.mrb[46].mxu1 }
 0x35c   : > { %v1426_v26 = vpop.f32.mrb[47].mxu1 }
 0x35d   : > { %v2708_v15 = vpack.c.bf16 %v1426_v26, %v1420_v61 }
 0x35f   : > { %v3797_v5 = vpop.f32.mrb[48].mxu1  ;;  %2709 = vmatprep.subr.bf16.mxu0 %v2708_v15 }
 0x360   : > { %v1432_v35 = vpop.f32.mrb[49].mxu1  ;;  %2711 = vmatpush3.bf16.msra.mxu0 %v2708_v15 }
 0x363   : > { %v3799_v1 = vpop.f32.mrb[50].mxu1 }
 0x364   : > { %v1438_v38 = vpop.f32.mrb[51].mxu1 }
 0x365   : > { %v2712_v8 = vpack.c.bf16 %v1438_v38, %v1432_v35 }
 0x367   : > { %v3801_v62 = vpop.f32.mrb[52].mxu1  ;;  %2713 = vmatprep.subr.bf16.mxu0 %v2712_v8 }
 0x368   : > { %v1444_v23 = vpop.f32.mrb[53].mxu1  ;;  %2715 = vmatpush3.bf16.msra.mxu0 %v2712_v8 }
 0x36b   : > { %v3803_v2 = vpop.f32.mrb[54].mxu1 }
 0x36c   : > { %v1450_v12 = vpop.f32.mrb[55].mxu1 }
 0x36d   : > { %v2716_v21 = vpack.c.bf16 %v1450_v12, %v1444_v23 }
 0x36f   : > { %v3805_v10 = vpop.f32.mrb[56].mxu1  ;;  %2717 = vmatprep.subr.bf16.mxu0 %v2716_v21 }
 0x370   : > { %v1456_v61 = vpop.f32.mrb[57].mxu1  ;;  %2719 = vmatpush3.bf16.msra.mxu0 %v2716_v21 }
 0x373   : > { %v3807_v26 = vpop.f32.mrb[58].mxu1 }
 0x374   : > { %v1462_v15 = vpop.f32.mrb[59].mxu1 }
 0x375   : > { %v2720_v51 = vpack.c.bf16 %v1462_v15, %v1456_v61 }
 0x377   : > { %v3809_v33 = vpop.f32.mrb[60].mxu1  ;;  %2721 = vmatprep.subr.bf16.mxu0 %v2720_v51 }
 0x378   : > { %v1468_v35 = vpop.f32.mrb[61].mxu1  ;;  %2723 = vmatpush3.bf16.msra.mxu0 %v2720_v51 }
 0x37b   : > { %v3811_v38 = vpop.f32.mrb[62].mxu1 }
 0x37c   : > { %v1474_v8 = vpop.f32.mrb[63].mxu1 }
 0x37d   : > { %v2724_v39 = vpack.c.bf16 %v1474_v8, %v1468_v35 }
 0x37f   : > { %v3813_v44 = vpop.f32.mrb[64].mxu1  ;;  %2725 = vmatprep.subr.bf16.mxu0 %v2724_v39 }
 0x380   : > { %v1480_v23 = vpop.f32.mrb[65].mxu1  ;;  %2727 = vmatpush3.bf16.msra.mxu0 %v2724_v39 }
 0x383   : > { %v3815_v12 = vpop.f32.mrb[66].mxu1  ;;  %2489 = vmatmul.mubr.f32.vlgmr.msra.gmra.mrb[64].mxu0 %v3335_v30 }
 0x384   : > { %v1486_v21 = vpop.f32.mrb[67].mxu1  ;;  %2491 = vmatprep.mubr.f32.mxu0 %v3338_v32 }
 0x385   : > { %v2728_v61 = vpack.c.bf16 %v1486_v21, %v1480_v23 }
 0x387   : > { %v3819_v15 = vpop.f32.mrb[68].mxu1  ;;  %2492 = vmatmul.mubr.f32.gmra.mrb[66].mxu0 %v3345_v34  ;;  %2729 = vmatprep.subr.bf16.mxu0 %v2728_v61 }
 0x388   : > { %v1492_v51 = vpop.f32.mrb[69].mxu1  ;;  %2731 = vmatpush3.bf16.msra.mxu0 %v2728_v61  ;;  %2494 = vmatprep.mubr.f32.mxu0 %v3348_v37  ;;  %v4267_v61 = vld [vmem:[#allocation12_spill] sm:$0xff] }
 0x38b   : > { %v3823_v35 = vpop.f32.mrb[70].mxu1  ;;  %2495 = vmatmul.mubr.f32.gmra.mrb[68].mxu0 %v3355_v41 }
 0x38c   : > { %v1498_v39 = vpop.f32.mrb[71].mxu1  ;;  %2497 = vmatprep.mubr.f32.mxu0 %v3358_v43 }
 0x38d   : > { %v2732_v30 = vpack.c.bf16 %v1498_v39, %v1492_v51 }
 0x38f   : > { %v3827_v8 = vpop.f32.mrb[72].mxu1  ;;  %2498 = vmatmul.mubr.f32.gmra.mrb[70].mxu0 %v3365_v46  ;;  %2733 = vmatprep.subr.bf16.mxu0 %v2732_v30 }
 0x390   : > { %v1504_v32 = vpop.f32.mrb[73].mxu1  ;;  %2735 = vmatpush3.bf16.msra.mxu0 %v2732_v30  ;;  %2500 = vmatprep.mubr.f32.mxu0 %v3368_v48  ;;  %v4266_v48 = vld [vmem:[#allocation11_spill] sm:$0xff] }
 0x393   : > { %v3831_v34 = vpop.f32.mrb[74].mxu1  ;;  %2501 = vmatmul.mubr.f32.gmra.mrb[72].mxu0 %v3375_v52 }
 0x394   : > { %v1510_v37 = vpop.f32.mrb[75].mxu1  ;;  %2503 = vmatprep.mubr.f32.mxu0 %v3378_v55  ;;  %v4269_v55 = vld [vmem:[#allocation13_spill] sm:$0xff] }
 0x395   : > { %v2736_v41 = vpack.c.bf16 %v1510_v37, %v1504_v32 }
 0x397   : > { %v3835_v23 = vpop.f32.mrb[76].mxu1  ;;  %2504 = vmatmul.mubr.f32.gmra.mrb[74].mxu0 %v3385_v57  ;;  %2737 = vmatprep.subr.bf16.mxu0 %v2736_v41  ;;  %v4270_v57 = vld [vmem:[#allocation14_spill] sm:$0xff] }
 0x398   : > { %4265 = vst [vmem:[#allocation68_spill] sm:$0xff] %v3835_v23  ;;  %v1516_v43 = vpop.f32.mrb[77].mxu1  ;;  %2739 = vmatpush3.bf16.msra.mxu0 %v2736_v41  ;;  %2506 = vmatprep.mubr.f32.mxu0 %v3388_v60  ;;  %v2828_v23 = vld [vmem:[%s3195_s7] sm:$0xff] }
 0x39b   : > { %v3839_v46 = vpop.f32.mrb[78].mxu1  ;;  %2507 = vmatmul.mubr.f32.gmra.mrb[76].mxu0 %v4266_v48 }
 0x39c   : > { %v1522_v21 = vpop.f32.mrb[79].mxu1  ;;  %2509 = vmatprep.mubr.f32.mxu0 %v4267_v61 }
 0x39d   : > { %v2740_v52 = vpack.c.bf16 %v1522_v21, %v1516_v43 }
 0x39f   : > { %v3843_v51 = vpop.f32.mrb[80].mxu1  ;;  %2510 = vmatmul.mubr.f32.gmra.mrb[78].mxu0 %v4269_v55  ;;  %2741 = vmatprep.subr.bf16.mxu0 %v2740_v52 }
 0x3a0   : > { %4268 = vst [vmem:[#allocation11_spill] sm:$0xff] %v3843_v51  ;;  %v1528_v39 = vpop.f32.mrb[81].mxu1  ;;  %2743 = vmatpush3.bf16.msra.mxu0 %v2740_v52  ;;  %2544 = vmatprep.mubr.f32.mxu0 %v4270_v57 }
 0x3a3   : > { %v3847_v30 = vpop.f32.mrb[82].mxu1 }
 0x3a4   : > { %4271 = vst [vmem:[#allocation12_spill] sm:$0xff] %v3847_v30  ;;  %v1534_v60 = vpop.f32.mrb[83].mxu1 }
 0x3a5   : > { %v2744_v32 = vpack.c.bf16 %v1534_v60, %v1528_v39 }
 0x3a7   : > { %v3849_v37 = vpop.f32.mrb[84].mxu1  ;;  %2745 = vmatprep.subr.bf16.mxu0 %v2744_v32 }
 0x3a8   : > { %4272 = vst [vmem:[#allocation13_spill] sm:$0xff] %v3849_v37  ;;  %v1540_v41 = vpop.f32.mrb[85].mxu1  ;;  %2747 = vmatpush3.bf16.msra.mxu0 %v2744_v32 }
 0x3ab   : > { %v3851_v48 = vpop.f32.mrb[86].mxu1 }
 0x3ac   : > { %4273 = vst [vmem:[#allocation14_spill] sm:$0xff] %v3851_v48  ;;  %v1546_v43 = vpop.f32.mrb[87].mxu1 }
 0x3ad   : > { %v2748_v21 = vpack.c.bf16 %v1546_v43, %v1540_v41  ;;  %v4278_v41 = vld [vmem:[#allocation15_spill] sm:$0xff]  ;;  %v4279_v43 = vld [vmem:[#allocation16_spill] sm:$0xff] }
 0x3af   : > { %v3853_v61 = vpop.f32.mrb[88].mxu1  ;;  %2749 = vmatprep.subr.bf16.mxu0 %v2748_v21 }
 0x3b0   : > { %4274 = vst [vmem:[#allocation69_spill] sm:$0xff] %v3853_v61  ;;  %v1552_v55 = vpop.f32.mrb[89].mxu1  ;;  %2751 = vmatpush3.bf16.msra.mxu0 %v2748_v21  ;;  %v4280_v21 = vld [vmem:[#allocation17_spill] sm:$0xff]  ;;  %v4281_v61 = vld [vmem:[#allocation18_spill] sm:$0xff] }
 0x3b3   : > { %v3855_v52 = vpop.f32.mrb[90].mxu1 }
 0x3b4   : > { %4275 = vst [vmem:[#allocation70_spill] sm:$0xff] %v3855_v52  ;;  %v1558_v57 = vpop.f32.mrb[91].mxu1 }
 0x3b5   : > { %v2752_v51 = vpack.c.bf16 %v1558_v57, %v1552_v55  ;;  %v4282_v55 = vld [vmem:[#allocation19_spill] sm:$0xff]  ;;  %v4283_v57 = vld [vmem:[#allocation20_spill] sm:$0xff] }
 0x3b7   : > { %v3857_v30 = vpop.f32.mrb[92].mxu1  ;;  %2753 = vmatprep.subr.bf16.mxu0 %v2752_v51 }
 0x3b8   : > { %4276 = vst [vmem:[#allocation71_spill] sm:$0xff] %v3857_v30  ;;  %v1564_v39 = vpop.f32.mrb[93].mxu1  ;;  %2755 = vmatpush3.bf16.msra.mxu0 %v2752_v51  ;;  %v4284_v30 = vld [vmem:[#allocation21_spill] sm:$0xff]  ;;  %v4285_v51 = vld [vmem:[#allocation22_spill] sm:$0xff] }
 0x3bb   : > { %v3859_v60 = vpop.f32.mrb[94].mxu1 }
 0x3bc   : > { %4277 = vst [vmem:[#allocation72_spill] sm:$0xff] %v3859_v60  ;;  %v1570_v32 = vpop.f32.mrb[95].mxu1  ;;  %v4286_v60 = vld [vmem:[#allocation23_spill] sm:$0xff] }
 0x3bd   : > { %v2756_v37 = vpack.c.bf16 %v1570_v32, %v1564_v39  ;;  %v4287_v39 = vld [vmem:[#allocation24_spill] sm:$0xff]  ;;  %v4289_v32 = vld [vmem:[#allocation26_spill] sm:$0xff] }
 0x3bf   : > { %2757 = vmatprep.subr.bf16.mxu0 %v2756_v37 }
 0x3c0   : > { %2759 = vmatpush3.bf16.msra.mxu0 %v2756_v37  ;;  %v4288_v37 = vld [vmem:[#allocation25_spill] sm:$0xff] }
 0x3c3   : > { %2545 = vmatmul.mubr.f32.vlgmr.msra.gmra.mrb[80].mxu0 %v4278_v41  ;;  %v4290_v41 = vld [vmem:[#allocation27_spill] sm:$0xff] }
 0x3c4   : > { %2547 = vmatprep.mubr.f32.mxu0 %v4279_v43  ;;  %v4292_v43 = vld [vmem:[#allocation29_spill] sm:$0xff] }
 0x3c7   : > { %2548 = vmatmul.mubr.f32.gmra.mrb[82].mxu0 %v4280_v21 }
 0x3c8   : > { %2550 = vmatprep.mubr.f32.mxu0 %v4281_v61  ;;  %v4291_v61 = vld [vmem:[#allocation28_spill] sm:$0xff] }
 0x3cb   : > { %2551 = vmatmul.mubr.f32.gmra.mrb[84].mxu0 %v4282_v55 }
 0x3cc   : > { %2553 = vmatprep.mubr.f32.mxu0 %v4283_v57 }
 0x3cf   : > { %2554 = vmatmul.mubr.f32.gmra.mrb[86].mxu0 %v4284_v30  ;;  %v3879_v30 = vld [vmem:[%s4132_s4 + $0x1] ss:$0 sm:$0xff] }
 0x3d0   : > { %2556 = vmatprep.mubr.f32.mxu0 %v4285_v51  ;;  %v1902_v21 = vadd.f32 %v3879_v30, %v3783_v31  ;;  %v1901_v51 = vadd.f32 %v3879_v30, %v3781_v47  ;;  %v1904_v52 = vadd.f32 %v3879_v30, %v3787_v28  ;;  %v4293_v31 = vld [vmem:[#allocation30_spill] sm:$0xff]  ;;  %v1249_v47 = vadd.f32 %v2828_v23, %v3516_v59  ;;  %v2830_v23 = vld [vmem:[%s3195_s7 + $0x10] sm:$0xff] }
 0x3d3   : > { %2557 = vmatmul.mubr.f32.gmra.mrb[88].mxu0 %v4286_v60 }
 0x3d4   : > { %2559 = vmatprep.mubr.f32.mxu0 %v4287_v39 }
 0x3d7   : > { %2560 = vmatmul.mubr.f32.gmra.mrb[90].mxu0 %v4288_v37 }
 0x3d8   : > { %2562 = vmatprep.mubr.f32.mxu0 %v4289_v32 }
 0x3db   : > { %2563 = vmatmul.mubr.f32.gmra.mrb[92].mxu0 %v4290_v41 }
 0x3dc   : > { %2565 = vmatprep.mubr.f32.mxu0 %v4291_v61  ;;  %v2827_v61 = vld [vmem:[%s3195_s7 + $0x8] sm:$0xff] }
 0x3df   : > { %2566 = vmatmul.mubr.f32.gmra.mrb[94].mxu0 %v4292_v43  ;;  %v1250_v43 = vadd.f32 %v2827_v61, %v3512_v27 }
 0x456   : > { %v2490_v60 = vpop.f32.mrb[64].mxu0 }
 0x457   : > { %v1864_v55 = vmul.f32 %v2490_v60, %v3495_v13  ;;  %v1639_v57 = vpop.f32.mrb[65].mxu0 }
 0x458   : > { %v1863_v39 = vmul.f32 %v1639_v57, %v3491_v7  ;;  %v1903_v7 = vadd.f32 %v3879_v30, %v3785_v58 }
 0x459   : > { %v1934_v37 = vadd.f32 %v1902_v21, %v1864_v55 }
 0x45a   : > { %v1933_v32 = vadd.f32 %v1901_v51, %v1863_v39  ;;  %v2493_v41 = vpop.f32.mrb[66].mxu0 }
 0x45b   : > { %v1966_v48 = vmul.f32 0.5, %v1934_v37  ;;  %v1866_v13 = vmul.f32 %v2493_v41, %v4293_v31  ;;  %v1649_v60 = vpop.f32.mrb[67].mxu0  ;;  %v2829_v37 = vld [vmem:[%s3195_s7 + $0x18] sm:$0xff]  ;;  %v1906_v41 = vadd.f32 %v3879_v30, %v3791_v20 }
 0x45c   : > { %v1965_v21 = vmul.f32 0.5, %v1933_v32  ;;  %v1865_v55 = vmul.f32 %v1649_v60, %v3489_v50  ;;  %v1252_v61 = vadd.f32 %v2829_v37, %v3527_v0  ;;  %v1905_v0 = vadd.f32 %v3879_v30, %v3789_v56 }
 0x45d   : > { %v1998_v57 = vadd.f32 %v1966_v48, %v1250_v43  ;;  %v1936_v27 = vadd.f32 %v1904_v52, %v1866_v13  ;;  %v1251_v48 = vadd.f32 %v2830_v23, %v3530_v25  ;;  %v4294_v52 = vld [vmem:[#allocation31_spill] sm:$0xff]  ;;  %v1908_v25 = vadd.f32 %v3879_v30, %v3795_v19 }
 0x45e   : > { %v1997_v51 = vadd.f32 %v1965_v21, %v1249_v47  ;;  %v1935_v39 = vadd.f32 %v1903_v7, %v1865_v55  ;;  %v2496_v28 = vpop.f32.mrb[68].mxu0  ;;  %v4295_v21 = vld [vmem:[#allocation32_spill] sm:$0xff] }
 0x45f   : > { %2030 = vst [vmem:[%s3903_s11 + $0x8] sm:$0xff] %v1998_v57  ;;  %v1968_v59 = vmul.f32 0.5, %v1936_v27  ;;  %v1868_v50 = vmul.f32 %v2496_v28, %v3497_v17  ;;  %v1659_v58 = vpop.f32.mrb[69].mxu0  ;;  %v2831_v17 = vld [vmem:[%s3195_s7 + $0x28] sm:$0xff]  ;;  %v2832_v27 = vld [vmem:[%s3195_s7 + $0x20] sm:$0xff] }
 0x460   : > { %2029 = vst [vmem:[%s3903_s11] sm:$0xff] %v1997_v51  ;;  %v1967_v20 = vmul.f32 0.5, %v1935_v39  ;;  %v1867_v32 = vmul.f32 %v1659_v58, %v4294_v52  ;;  %v1254_v7 = vadd.f32 %v2831_v17, %v3543_v40  ;;  %v1253_v51 = vadd.f32 %v2832_v27, %v3546_v36  ;;  %v4296_v40 = vld [vmem:[#allocation33_spill] sm:$0xff]  ;;  %v2833_v58 = vld [vmem:[%s3195_s7 + $0x38] sm:$0xff] }
 0x461   : > { %v2000_v43 = vadd.f32 %v1968_v59, %v1252_v61  ;;  %v1938_v31 = vadd.f32 %v1906_v41, %v1868_v50  ;;  %v1907_v39 = vadd.f32 %v3879_v30, %v3793_v24  ;;  %v1256_v23 = vadd.f32 %v2833_v58, %v3555_v49  ;;  %v2834_v52 = vld [vmem:[%s3195_s7 + $0x30] sm:$0xff]  ;;  %v4300_v58 = vld [vmem:[#allocation38_spill] sm:$0xff] }
 0x462   : > { %v1999_v13 = vadd.f32 %v1967_v20, %v1251_v48  ;;  %v1937_v60 = vadd.f32 %v1905_v0, %v1867_v32  ;;  %v2499_v47 = vpop.f32.mrb[70].mxu0  ;;  %v1910_v36 = vadd.f32 %v3879_v30, %v3799_v1  ;;  %v4297_v48 = vld [vmem:[#allocation34_spill] sm:$0xff]  ;;  %v1255_v32 = vadd.f32 %v2834_v52, %v3560_v45 }
 0x463   : > { %2032 = vst [vmem:[%s3903_s11 + $0x18] sm:$0xff] %v2000_v43  ;;  %v1970_v56 = vmul.f32 0.5, %v1938_v31  ;;  %v1870_v55 = vmul.f32 %v2499_v47, %v4295_v21  ;;  %v1669_v57 = vpop.f32.mrb[71].mxu0  ;;  %v1909_v43 = vadd.f32 %v3879_v30, %v3797_v5  ;;  %v1912_v45 = vadd.f32 %v3879_v30, %v3803_v2 }
 0x464   : > { %2031 = vst [vmem:[%s3903_s11 + $0x10] sm:$0xff] %v1999_v13  ;;  %v1969_v28 = vmul.f32 0.5, %v1937_v60  ;;  %v1869_v37 = vmul.f32 %v1669_v57, %v4296_v40  ;;  %v1911_v57 = vadd.f32 %v3879_v30, %v3801_v62 }
 0x465   : > { %v2002_v19 = vadd.f32 %v1970_v56, %v1254_v7  ;;  %v1940_v61 = vadd.f32 %v1908_v25, %v1870_v55  ;;  %v2835_v7 = vld [vmem:[%s3195_s7 + $0x48] sm:$0xff] }
 0x466   : > { %v2001_v41 = vadd.f32 %v1969_v28, %v1253_v51  ;;  %v1939_v59 = vadd.f32 %v1907_v39, %v1869_v37  ;;  %v2502_v50 = vpop.f32.mrb[72].mxu0  ;;  %v1258_v25 = vadd.f32 %v2835_v7, %v3571_v54  ;;  %v4298_v54 = vld [vmem:[#allocation35_spill] sm:$0xff]  ;;  %v4304_v7 = vld [vmem:[#allocation41_spill] sm:$0xff] }
 0x467   : > { %2034 = vst [vmem:[%s3903_s11 + $0x28] sm:$0xff] %v2002_v19  ;;  %v1972_v24 = vmul.f32 0.5, %v1940_v61  ;;  %v1872_v0 = vmul.f32 %v2502_v50, %v4297_v48  ;;  %v1679_v20 = vpop.f32.mrb[73].mxu0  ;;  %v4299_v61 = vld [vmem:[#allocation36_spill] sm:$0xff]  ;;  %v2838_v50 = vld [vmem:[%s3195_s7 + $0x50] sm:$0xff] }
 0x468   : > { %2033 = vst [vmem:[%s3903_s11 + $0x20] sm:$0xff] %v2001_v41  ;;  %v1971_v31 = vmul.f32 0.5, %v1939_v59  ;;  %v1871_v49 = vmul.f32 %v1679_v20, %v3541_v3  ;;  %v2836_v3 = vld [vmem:[%s3195_s7 + $0x40] sm:$0xff] }
 0x469   : > { %v2004_v1 = vadd.f32 %v1972_v24, %v1256_v23  ;;  %v1942_v13 = vadd.f32 %v1910_v36, %v1872_v0  ;;  %v1257_v55 = vadd.f32 %v2836_v3, %v3574_v18  ;;  %v1914_v18 = vadd.f32 %v3879_v30, %v3807_v26 }
 0x46a   : > { %v2003_v60 = vadd.f32 %v1971_v31, %v1255_v32  ;;  %v1941_v47 = vadd.f32 %v1909_v43, %v1871_v49  ;;  %v2505_v17 = vpop.f32.mrb[74].mxu0  ;;  %v1259_v23 = vadd.f32 %v2838_v50, %v4300_v58  ;;  %v1913_v36 = vadd.f32 %v3879_v30, %v3805_v10  ;;  %v2839_v43 = vld [vmem:[%s3195_s7 + $0x68] sm:$0xff]  ;;  %v4302_v31 = vld [vmem:[#allocation39_spill] sm:$0xff] }
 0x46b   : > { %2036 = vst [vmem:[%s3903_s11 + $0x38] sm:$0xff] %v2004_v1  ;;  %v1974_v5 = vmul.f32 0.5, %v1942_v13  ;;  %v1874_v56 = vmul.f32 %v2505_v17, %v3558_v6  ;;  %v1689_v21 = vpop.f32.mrb[75].mxu0  ;;  %v2837_v6 = vld [vmem:[%s3195_s7 + $0x58] sm:$0xff]  ;;  %v1262_v49 = vadd.f32 %v2839_v43, %v4302_v31  ;;  %v1916_v1 = vadd.f32 %v3879_v30, %v3811_v38  ;;  %v4303_v13 = vld [vmem:[#allocation40_spill] sm:$0xff]  ;;  %v2840_v17 = vld [vmem:[%s3195_s7 + $0x60] sm:$0xff] }
 0x46c   : > { %2035 = vst [vmem:[%s3903_s11 + $0x30] sm:$0xff] %v2003_v60  ;;  %v1973_v27 = vmul.f32 0.5, %v1941_v47  ;;  %v1873_v51 = vmul.f32 %v1689_v21, %v4298_v54  ;;  %v1260_v19 = vadd.f32 %v2837_v6, %v3587_v63  ;;  %v4301_v63 = vld [vmem:[#allocation37_spill] sm:$0xff] }
 0x46d   : > { %v2006_v2 = vadd.f32 %v1974_v5, %v1258_v25  ;;  %v1944_v39 = vadd.f32 %v1912_v45, %v1874_v56  ;;  %v1261_v25 = vadd.f32 %v2840_v17, %v4304_v7  ;;  %v1915_v45 = vadd.f32 %v3879_v30, %v3809_v33  ;;  %v4305_v56 = vld [vmem:[#allocation42_spill] sm:$0xff] }
 0x46e   : > { %v2005_v28 = vadd.f32 %v1973_v27, %v1257_v55  ;;  %v1943_v40 = vadd.f32 %v1911_v57, %v1873_v51  ;;  %v2508_v37 = vpop.f32.mrb[76].mxu0  ;;  %v2841_v27 = vld [vmem:[%s3195_s7 + $0x78] sm:$0xff]  ;;  %v1921_v7 = vadd.f32 %v3879_v30, %v3827_v8 }
 0x46f   : > { %2038 = vst [vmem:[%s3903_s11 + $0x48] sm:$0xff] %v2006_v2  ;;  %v1976_v62 = vmul.f32 0.5, %v1944_v39  ;;  %v1876_v41 = vmul.f32 %v2508_v37, %v4299_v61  ;;  %v1699_v59 = vpop.f32.mrb[77].mxu0  ;;  %v1264_v54 = vadd.f32 %v2841_v27, %v3615_v14  ;;  %v2842_v2 = vld [vmem:[%s3195_s7 + $0x70] sm:$0xff]  ;;  %v4306_v39 = vld [vmem:[#allocation43_spill] sm:$0xff]  ;;  %v1917_v61 = vadd.f32 %v3879_v30, %v3813_v44 }
 0x470   : > { %2037 = vst [vmem:[%s3903_s11 + $0x40] sm:$0xff] %v2005_v28  ;;  %v1975_v24 = vmul.f32 0.5, %v1943_v40  ;;  %v1875_v48 = vmul.f32 %v1699_v59, %v4301_v63  ;;  %v1263_v28 = vadd.f32 %v2842_v2, %v4306_v39  ;;  %v1920_v63 = vadd.f32 %v3879_v30, %v3823_v35  ;;  %v4312_v2 = vld [vmem:[#allocation68_spill] sm:$0xff] }
 0x471   : > { %v2008_v26 = vadd.f32 %v1976_v62, %v1260_v19  ;;  %v1946_v0 = vadd.f32 %v1914_v18, %v1876_v41  ;;  %v1918_v19 = vadd.f32 %v3879_v30, %v3815_v12  ;;  %v4307_v18 = vld [vmem:[#allocation44_spill] sm:$0xff]  ;;  %v4308_v41 = vld [vmem:[#allocation45_spill] sm:$0xff]  ;;  %v4309_v12 = vld [vmem:[#allocation46_spill] sm:$0xff]  ;;  %v1923_v39 = vadd.f32 %v3879_v30, %v4312_v2 }
 0x472   : > { %v2007_v20 = vadd.f32 %v1975_v24, %v1259_v23  ;;  %v1945_v52 = vadd.f32 %v1913_v36, %v1875_v48  ;;  %v2511_v32 = vpop.f32.mrb[78].mxu0  ;;  %v2843_v36 = vld [vmem:[%s3195_s7 + $0x88] sm:$0xff]  ;;  %v2854_v2 = vld [vmem:[%s3195_s7 + $0xd0] sm:$0xff] }
 0x473   : > { %2040 = vst [vmem:[%s3903_s11 + $0x58] sm:$0xff] %v2008_v26  ;;  %v1978_v10 = vmul.f32 0.5, %v1946_v0  ;;  %v1878_v60 = vmul.f32 %v2511_v32, %v4303_v13  ;;  %v1709_v47 = vpop.f32.mrb[79].mxu0  ;;  %v1266_v24 = vadd.f32 %v2843_v36, %v3655_v11  ;;  %v4317_v36 = vld [vmem:[#allocation54_spill] sm:$0xff] }
 0x474   : > { %2039 = vst [vmem:[%s3903_s11 + $0x50] sm:$0xff] %v2007_v20  ;;  %v1977_v5 = vmul.f32 0.5, %v1945_v52  ;;  %v1877_v21 = vmul.f32 %v1709_v47, %v4305_v56  ;;  %v2844_v20 = vld [vmem:[%s3195_s7 + $0x80] sm:$0xff]  ;;  %v1919_v52 = vadd.f32 %v3879_v30, %v3819_v15 }
 0x475   : > { %v2010_v38 = vadd.f32 %v1978_v10, %v1262_v49  ;;  %v1948_v3 = vadd.f32 %v1916_v1, %v1878_v60  ;;  %v1265_v44 = vadd.f32 %v2844_v20, %v3660_v4  ;;  %v2845_v10 = vld [vmem:[%s3195_s7 + $0x98] sm:$0xff]  ;;  %v1922_v60 = vadd.f32 %v3879_v30, %v3831_v34 }
 0x476   : > { %v2009_v55 = vadd.f32 %v1977_v5, %v1261_v25  ;;  %v1947_v57 = vadd.f32 %v1915_v45, %v1877_v21  ;;  %v1268_v13 = vadd.f32 %v2845_v10, %v3671_v42  ;;  %v4310_v42 = vld [vmem:[#allocation47_spill] sm:$0xff] }
 0x477   : > { %2042 = vst [vmem:[%s3903_s11 + $0x68] sm:$0xff] %v2010_v38  ;;  %v1980_v51 = vmul.f32 0.5, %v1948_v3 }
 0x478   : > { %2041 = vst [vmem:[%s3903_s11 + $0x60] sm:$0xff] %v2009_v55  ;;  %v1979_v33 = vmul.f32 0.5, %v1947_v57  ;;  %v4311_v55 = vld [vmem:[#allocation48_spill] sm:$0xff] }
 0x479   : > { %v2012_v40 = vadd.f32 %v1980_v51, %v1264_v54  ;;  %v2848_v54 = vld [vmem:[%s3195_s7 + $0xa0] sm:$0xff] }
 0x47a   : > { %v2011_v37 = vadd.f32 %v1979_v33, %v1263_v28  ;;  %v1269_v51 = vadd.f32 %v2848_v54, %v3690_v16 }
 0x47b   : > { %2044 = vst [vmem:[%s3903_s11 + $0x78] sm:$0xff] %v2012_v40 }
 0x47c   : > { %2043 = vst [vmem:[%s3903_s11 + $0x70] sm:$0xff] %v2011_v37 }
 0x496   : > { %v2546_v6 = vpop.f32.mrb[80].mxu0 }
 0x497   : > { %v1880_v62 = vmul.f32 %v2546_v6, %v4307_v18  ;;  %v1784_v14 = vpop.f32.mrb[81].mxu0  ;;  %v2849_v18 = vld [vmem:[%s3195_s7 + $0xb8] sm:$0xff] }
 0x498   : > { %v1879_v59 = vmul.f32 %v1784_v14, %v4308_v41 }
 0x499   : > { %v1950_v50 = vadd.f32 %v1918_v19, %v1880_v62  ;;  %v4314_v62 = vld [vmem:[#allocation52_spill] sm:$0xff] }
 0x49a   : > { %v1949_v58 = vadd.f32 %v1917_v61, %v1879_v59  ;;  %v2549_v23 = vpop.f32.mrb[82].mxu0  ;;  %v1272_v14 = vadd.f32 %v2849_v18, %v4314_v62  ;;  %v4315_v61 = vld [vmem:[#allocation12_spill] sm:$0xff]  ;;  %v4316_v59 = vld [vmem:[#allocation50_spill] sm:$0xff] }
 0x49b   : > { %v1982_v48 = vmul.f32 0.5, %v1950_v50  ;;  %v1882_v26 = vmul.f32 %v2549_v23, %v4309_v12  ;;  %v1794_v0 = vpop.f32.mrb[83].mxu0  ;;  %v1926_v16 = vadd.f32 %v3879_v30, %v4315_v61  ;;  %v2850_v23 = vld [vmem:[%s3195_s7 + $0xb0] sm:$0xff]  ;;  %v2855_v61 = vld [vmem:[%s3195_s7 + $0xe8] sm:$0xff] }
 0x49c   : > { %v1981_v32 = vmul.f32 0.5, %v1949_v58  ;;  %v1881_v43 = vmul.f32 %v1794_v0, %v3638_v9  ;;  %v2846_v9 = vld [vmem:[%s3195_s7 + $0x90] sm:$0xff] }
 0x49d   : > { %v2014_v11 = vadd.f32 %v1982_v48, %v1266_v24  ;;  %v1952_v31 = vadd.f32 %v1920_v63, %v1882_v26  ;;  %v1267_v17 = vadd.f32 %v2846_v9, %v3674_v22  ;;  %v1924_v22 = vadd.f32 %v3879_v30, %v3839_v46  ;;  %v4318_v63 = vld [vmem:[#allocation11_spill] sm:$0xff] }
 0x49e   : > { %v2013_v49 = vadd.f32 %v1981_v32, %v1265_v44  ;;  %v1951_v35 = vadd.f32 %v1919_v52, %v1881_v43  ;;  %v2552_v1 = vpop.f32.mrb[84].mxu0  ;;  %v1271_v24 = vadd.f32 %v2850_v23, %v4317_v36  ;;  %v1925_v48 = vadd.f32 %v3879_v30, %v4318_v63  ;;  %v4319_v26 = vld [vmem:[#allocation51_spill] sm:$0xff] }
 0x49f   : > { %2046 = vst [vmem:[%s3903_s11 + $0x88] sm:$0xff] %v2014_v11  ;;  %v1984_v4 = vmul.f32 0.5, %v1952_v31  ;;  %v1884_v15 = vmul.f32 %v2552_v1, %v3642_v53  ;;  %v1804_v47 = vpop.f32.mrb[85].mxu0  ;;  %v2847_v53 = vld [vmem:[%s3195_s7 + $0xa8] sm:$0xff]  ;;  %v4334_v23 = vld [vmem:[#allocation63_spill] sm:$0xff] }
 0x4a0   : > { %2045 = vst [vmem:[%s3903_s11 + $0x80] sm:$0xff] %v2013_v49  ;;  %v1983_v25 = vmul.f32 0.5, %v1951_v35  ;;  %v1883_v45 = vmul.f32 %v1804_v47, %v4310_v42  ;;  %v1270_v3 = vadd.f32 %v2847_v53, %v3687_v29  ;;  %v4313_v29 = vld [vmem:[#allocation49_spill] sm:$0xff]  ;;  %v2851_v11 = vld [vmem:[%s3195_s7 + $0xc8] sm:$0xff]  ;;  %v4321_v35 = vld [vmem:[#allocation14_spill] sm:$0xff] }
 0x4a1   : > { %v2016_v34 = vadd.f32 %v1984_v4, %v1268_v13  ;;  %v1954_v5 = vadd.f32 %v1922_v60, %v1884_v15  ;;  %v4320_v31 = vld [vmem:[#allocation56_spill] sm:$0xff]  ;;  %v1928_v1 = vadd.f32 %v3879_v30, %v4321_v35  ;;  %v4322_v13 = vld [vmem:[#allocation53_spill] sm:$0xff]  ;;  %v2852_v15 = vld [vmem:[%s3195_s7 + $0xc0] sm:$0xff] }
 0x4a2   : > { %v2015_v56 = vadd.f32 %v1983_v25, %v1267_v17  ;;  %v1953_v21 = vadd.f32 %v1921_v7, %v1883_v45  ;;  %v2555_v38 = vpop.f32.mrb[86].mxu0  ;;  %v1274_v49 = vadd.f32 %v2851_v11, %v4320_v31  ;;  %v4323_v47 = vld [vmem:[#allocation57_spill] sm:$0xff]  ;;  %v4325_v42 = vld [vmem:[#allocation55_spill] sm:$0xff]  ;;  %v2853_v53 = vld [vmem:[%s3195_s7 + $0xd8] sm:$0xff] }
 0x4a3   : > { %2048 = vst [vmem:[%s3903_s11 + $0x98] sm:$0xff] %v2016_v34  ;;  %v1986_v8 = vmul.f32 0.5, %v1954_v5  ;;  %v1886_v57 = vmul.f32 %v2555_v38, %v4311_v55  ;;  %v1814_v27 = vpop.f32.mrb[87].mxu0  ;;  %v1273_v9 = vadd.f32 %v2852_v15, %v4323_v47  ;;  %v4324_v17 = vld [vmem:[#allocation13_spill] sm:$0xff]  ;;  %v2856_v63 = vld [vmem:[%s3195_s7 + $0xe0] sm:$0xff]  ;;  %v4338_v35 = vld [vmem:[#allocation66_spill] sm:$0xff] }
 0x4a4   : > { %2047 = vst [vmem:[%s3903_s11 + $0x90] sm:$0xff] %v2015_v56  ;;  %v1985_v28 = vmul.f32 0.5, %v1953_v21  ;;  %v1885_v33 = vmul.f32 %v1814_v27, %v4313_v29  ;;  %v1927_v7 = vadd.f32 %v3879_v30, %v4324_v17  ;;  %v4328_v27 = vld [vmem:[#allocation58_spill] sm:$0xff]  ;;  %v4330_v29 = vld [vmem:[#allocation69_spill] sm:$0xff] }
 0x4a5   : > { %v2018_v46 = vadd.f32 %v1986_v8, %v1270_v3  ;;  %v1956_v40 = vadd.f32 %v1924_v22, %v1886_v57  ;;  %v4326_v3 = vld [vmem:[#allocation60_spill] sm:$0xff]  ;;  %v4327_v8 = vld [vmem:[#allocation70_spill] sm:$0xff] }
 0x4a6   : > { %v2017_v37 = vadd.f32 %v1985_v28, %v1269_v51  ;;  %v1955_v6 = vadd.f32 %v1923_v39, %v1885_v33  ;;  %v2558_v19 = vpop.f32.mrb[88].mxu0  ;;  %v1276_v22 = vadd.f32 %v2853_v53, %v4326_v3  ;;  %v1930_v55 = vadd.f32 %v3879_v30, %v4327_v8  ;;  %v4329_v39 = vld [vmem:[#allocation61_spill] sm:$0xff] }
 0x4a7   : > { %2050 = vst [vmem:[%s3903_s11 + $0xa8] sm:$0xff] %v2018_v46  ;;  %v1988_v41 = vmul.f32 0.5, %v1956_v40  ;;  %v1888_v50 = vmul.f32 %v2558_v19, %v4316_v59  ;;  %v1824_v58 = vpop.f32.mrb[89].mxu0  ;;  %v1275_v28 = vadd.f32 %v2854_v2, %v4329_v39  ;;  %v1929_v33 = vadd.f32 %v3879_v30, %v4330_v29  ;;  %v4331_v40 = vld [vmem:[#allocation59_spill] sm:$0xff]  ;;  %v4333_v59 = vld [vmem:[#allocation72_spill] sm:$0xff] }
 0x4a8   : > { %2049 = vst [vmem:[%s3903_s11 + $0xa0] sm:$0xff] %v2017_v37  ;;  %v1987_v12 = vmul.f32 0.5, %v1955_v6  ;;  %v1887_v0 = vmul.f32 %v1824_v58, %v4319_v26  ;;  %v4336_v26 = vld [vmem:[#allocation71_spill] sm:$0xff] }
 0x4a9   : > { %v2020_v20 = vadd.f32 %v1988_v41, %v1272_v14  ;;  %v1958_v44 = vadd.f32 %v1926_v16, %v1888_v50  ;;  %v4332_v16 = vld [vmem:[#allocation62_spill] sm:$0xff]  ;;  %v1932_v50 = vadd.f32 %v3879_v30, %v4333_v59 }
 0x4aa   : > { %v2019_v52 = vadd.f32 %v1987_v12, %v1271_v24  ;;  %v1957_v32 = vadd.f32 %v1925_v48, %v1887_v0  ;;  %v2561_v43 = vpop.f32.mrb[90].mxu0  ;;  %v1278_v41 = vadd.f32 %v2855_v61, %v4332_v16  ;;  %v4335_v48 = vld [vmem:[#allocation64_spill] sm:$0xff]  ;;  %v1931_v0 = vadd.f32 %v3879_v30, %v4336_v26 }
 0x4ab   : > { %2052 = vst [vmem:[%s3903_s11 + $0xb8] sm:$0xff] %v2020_v20  ;;  %v1990_v10 = vmul.f32 0.5, %v1958_v44  ;;  %v1890_v60 = vmul.f32 %v2561_v43, %v4322_v13  ;;  %v1834_v4 = vpop.f32.mrb[91].mxu0  ;;  %v1277_v12 = vadd.f32 %v2856_v63, %v4335_v48  ;;  %v4337_v44 = vld [vmem:[#allocation65_spill] sm:$0xff]  ;;  %v4339_v13 = vld [vmem:[#allocation67_spill] sm:$0xff] }
 0x4ac   : > { %2051 = vst [vmem:[%s3903_s11 + $0xb0] sm:$0xff] %v2019_v52  ;;  %v1989_v25 = vmul.f32 0.5, %v1957_v32  ;;  %v1889_v45 = vmul.f32 %v1834_v4, %v4325_v42 }
 0x4ad   : > { %v2022_v34 = vadd.f32 %v1990_v10, %v1274_v49  ;;  %v1960_v5 = vadd.f32 %v1928_v1, %v1890_v60  ;;  %v2857_v49 = vld [vmem:[%s3195_s7 + $0xf8] sm:$0xff]  ;;  %v2858_v10 = vld [vmem:[%s3195_s7 + $0xf0] sm:$0xff]  ;;  %s2997_s7 = smov [#allocation7]  }
 0x4ae   : > { %v2021_v56 = vadd.f32 %v1989_v25, %v1273_v9  ;;  %v1959_v21 = vadd.f32 %v1927_v7, %v1889_v45  ;;  %v2564_v38 = vpop.f32.mrb[92].mxu0  ;;  %v1280_v1 = vadd.f32 %v2857_v49, %v4338_v35  ;;  %v1279_v60 = vadd.f32 %v2858_v10, %v4339_v13  ;;  %s2921_s15 = sshll.u32 %s2997_s7, 4  ;;  %s2922_s15 = int_to_ptr.vmem [resolvable:$false] %s2921_s15 }
 0x4af   : > { %2054 = vst [vmem:[%s3903_s11 + $0xc8] sm:$0xff] %v2022_v34  ;;  %v1992_v57 = vmul.f32 0.5, %v1960_v5  ;;  %v1892_v54 = vmul.f32 %v2564_v38, %v4328_v27  ;;  %v1844_v51 = vpop.f32.mrb[93].mxu0  ;;  %s2923_s10 = scalar_lea.vmem %s2922_s15, 8192  ;;  %p2924_p13 = scmp.lt.s32.totalorder %s4082_s12, %s2922_s15 }
 0x4b0   : > { %2053 = vst [vmem:[%s3903_s11 + $0xc0] sm:$0xff] %v2021_v56  ;;  %v1991_v46 = vmul.f32 0.5, %v1959_v21  ;;  %v1891_v37 = vmul.f32 %v1844_v51, %v4331_v40  ;;  %p2925_p3 = scmp.lt.s32.totalorder %s2923_s10, %s2917_s6 }
 0x4b1   : > { %v2024_v6 = vadd.f32 %v1992_v57, %v1276_v22  ;;  %v1962_v19 = vadd.f32 %v1930_v55, %v1892_v54 }
 0x4b2   : > { %v2023_v18 = vadd.f32 %v1991_v46, %v1275_v28  ;;  %v1961_v62 = vadd.f32 %v1929_v33, %v1891_v37  ;;  %v2567_v14 = vpop.f32.mrb[94].mxu0  ;;  %p2926_p7 = por %p2925_p3, %p2924_p13 }
 0x4b3   : > { %2056 = vst [vmem:[%s3903_s11 + $0xd8] sm:$0xff] %v2024_v6  ;;  %v1994_v58 = vmul.f32 0.5, %v1962_v19  ;;  %v1894_v36 = vmul.f32 %v2567_v14, %v4334_v23  ;;  %v1854_v24 = vpop.f32.mrb[95].mxu0 }
 0x4b4   : > { %2055 = vst [vmem:[%s3903_s11 + $0xd0] sm:$0xff] %v2023_v18  ;;  %v1993_v20 = vmul.f32 0.5, %v1961_v62  ;;  %v1893_v52 = vmul.f32 %v1854_v24, %v4337_v44  ;;  %p2927_p9 = pnand %p2926_p7, %p2920_p10 }
 0x4b5   : > { %v2026_v32 = vadd.f32 %v1994_v58, %v1278_v41  ;;  %v1964_v43 = vadd.f32 %v1932_v50, %v1894_v36 }
 0x4b6   : > { %v2025_v11 = vadd.f32 %v1993_v20, %v1277_v12  ;;  %v1963_v31 = vadd.f32 %v1931_v0, %v1893_v52 }
 0x4b7   : > { %2058 = vst [vmem:[%s3903_s11 + $0xe8] sm:$0xff] %v2026_v32  ;;  %v1996_v30 = vmul.f32 0.5, %v1964_v43 }
 0x4b8   : > { %2057 = vst [vmem:[%s3903_s11 + $0xe0] sm:$0xff] %v2025_v11  ;;  %v1995_v4 = vmul.f32 0.5, %v1963_v31 }
 0x4b9   : > { %v2028_v15 = vadd.f32 %v1996_v30, %v1280_v1 }
 0x4ba   : > { %v2027_v47 = vadd.f32 %v1995_v4, %v1279_v60 }
 0x4bb   : > { %2060 = vst [vmem:[%s3903_s11 + $0xf8] sm:$0xff] %v2028_v15 }
 0x4bc   : > { %2059 = vst [vmem:[%s3903_s11 + $0xf0] sm:$0xff] %v2027_v47 }
 0x4bd   : > { %2930 = shalt.err (!%p2927_p9)
}
 0x4be   : > { %s2931_s29 = scalar_lea.hbm %s4080_s14, 4096  ;;  %s2935_s16 = scalar_lea.hbm %s4133_s5, 8192 }
 0x4bf   : > { %p2932_p2 = scmp.ne.s32.totalorder %s4080_s14, %s2931_s29  ;;  %p2936_p11 = scmp.lt.u32.totalorder %s4080_s14, %s4133_s5 }
 0x4c0   : > { %p2937_p1 = scmp.lt.u32.totalorder %s2935_s16, %s2931_s29  ;;  %p2939_p6 = scmp.lt.u32.totalorder %s2931_s29, %s4080_s14 }
 0x4c1   : > { %p2933_p0 = pnand %p2932_p2, %p3121_p12 }
 0x4c2   : > { %p2938_p4 = por %p2937_p1, %p2936_p11 }
 0x4c3   : > { %p2934_p5 = pneg %p2933_p0 }
 0x4c4   : > { %p2940_p8 = por %p2939_p6, %p2938_p4 }
 0x4c6   : > { %p2941_p10 = pnand %p2940_p8, %p2934_p5 }
 0x4c8   : > { %2944 = shalt.err (!%p2941_p10)
}
 0x4c9   : > { %s2998_s27 = smov 128   ;;  %s2999_s24 = smov 8  }
 0x4ca   : > { %2766 = dma.vmem_to_hbm [thread:$0]  (%p3121_p12), %s4082_s12, 4096, %s4080_s14, %s2062_s22, %s2998_s27, %s2998_s27, %s2999_s24  }
 0x4cb PF: > { %s2091_s26 = sand.u32 1, %s2975_s18   ;;  %p4340_p13 = scmp.ne.s32.totalorder %s4197_s25, 0 }
 0x4cc   : > { %p4341_p3 = scmp.ge.s32.totalorder %s2987_s21, 2  ;;  %s2092_s6 = scalar_lea.sflag [#allocation4], %s2091_s26 }
 0x4ce   : > { %p2777_p7 = pnand %p4341_p3, %p4340_p13 }
 0x4d0   : > { %2970 = dma.done.wait (!%p2777_p7), %s2092_s6, 4096  }
 0x4d1   : > { %2972 = vsyncadd (!%p2777_p7), %s2092_s6, 4294963200  ;;  %p19_p9 = scmp.ge.s32.totalorder %s3086_s30, 4   ;;  %s4342_s18 = smov %s2979_s19 }
 0x4d2   : > { %s4343_s19 = smov %s2983_s20  ;;  %s4344_s20 = smov %s3117_s8 }
 0x4d3   : > { %s4345_s21 = smov %s3086_s30  ;;  %21 = sbr.rel (!%p19_p9) target bundleno = 6 (0x6), region = 97 }
 0x4da   :  { %2097 = vsyncpa [#allocation3], 1 }
 0x4db   :  { %2099 = vsyncpa [#allocation3 + $0x1], 1 }
 0x4dc   :  { %2100 = vsyncpa [#allocation6], 1 }
 0x4dd   :  { %2101 = vsyncpa [#allocation4], 1 }
 0x4de   :  { %2103 = vsyncpa [#allocation4 + $0x1], 1 }

</bundles_post_ra>
